<compile_context>
chip_gen: v7x
topology: tpu7x:2x2x1
jax: 0.10.0
libtpu: 0.0.40
codegen_flags: <defaults>
</compile_context>

<pallas_src>
import jax
import jax.numpy as jnp
from jax import lax
from jax.experimental import pallas as pl
from jax.experimental.pallas import tpu as pltpu


def tetrad_v2_kernel(xt_ref, pos_ref, w1_ref, b1_ref, wh_ref, bh_ref,
                     wo_ref, bo_ref, out_ref):
    xt = xt_ref[...]                        # (4, TN)   rows: t, x, y, z
    pos = pos_ref[...]                      # (NB, 3)

    # Squared distance to each BH: (NB, TN) via pure 2-D broadcasts (VPU only,
    # no cross-lane reductions).
    d0 = xt[1:2, :] - pos[:, 0:1]           # (NB, TN)
    d1 = xt[2:3, :] - pos[:, 1:2]
    d2 = xt[3:4, :] - pos[:, 2:3]
    sq = d0 * d0 + d1 * d1 + d2 * d2        # (NB, TN)

    r = jnp.sqrt(sq)                        # (NB, TN)
    inv_r = lax.rsqrt(sq)                   # 1/r on the EUP, no extra divide

    # Fused layer 1: feat^T = [x^T; r; 1/r] (sublane concat) -> one K=8 matmul.
    feat = jnp.concatenate([xt, r, inv_r], axis=0)      # (4 + 2*NB, TN)

    hp = lax.Precision.HIGHEST              # bit-faithful to the f32 reference
    h = (jnp.dot(w1_ref[...], feat, precision=hp,
                 preferred_element_type=jnp.float32)
         + b1_ref[...])                     # (F, TN)

    num_layers = wh_ref.shape[0]            # static -> unrolled
    for l in range(num_layers):
        h = jnp.cos(jnp.dot(wh_ref[l], h, precision=hp,
                            preferred_element_type=jnp.float32)
                    + bh_ref[l])            # (F, TN), lane-dense cos / add

    out_ref[...] = (jnp.dot(wo_ref[...], h, precision=hp,
                            preferred_element_type=jnp.float32)
                    + bo_ref[...])          # (16, TN), unmasked lane-dense store


def _choose_tile(n, requested):
    """Pick a lane-dim tile: multiple of 128 dividing n, <= requested,
    and (when possible) giving >= 2 grid steps so v7x's two TCs both work."""
    if n % 128 != 0:
        return n                             # single step: block dim == full dim
    n_blocks = n // 128
    want = max(1, requested // 128)
    if n_blocks >= 2:
        want = min(want, n_blocks // 2)      # guarantee at least 2 grid steps
    want = max(1, want)
    best = 1
    for d in range(1, want + 1):
        if n_blocks % d == 0:
            best = d
    return best * 128


def tetrad_network_v2(x, pos, w1, b1, wh, bh, wo, bo, *, tile_n=1024):
    """Fused forward pass.

    x:   (N, 4)            f32, rows are [t, x, y, z]
    pos: (NB, 3)           f32 black-hole positions
    w1:  (F, 4 + 2*NB)     layer1 weight, PyTorch (out, in) layout
    b1:  (F,)
    wh:  (L, F, F)         hidden weights, PyTorch (out, in) layout
    bh:  (L, F)
    wo:  (16, F)           output weight, PyTorch (out, in) layout
    bo:  (16,)
    returns: (N, 4, 4) f32
    """
    n = x.shape[0]
    num_bh = pos.shape[0]
    in_dim = 4 + 2 * num_bh
    feat = w1.shape[0]
    num_layers = wh.shape[0]
    assert x.shape == (n, 4)
    assert w1.shape == (feat, in_dim)
    assert wh.shape == (num_layers, feat, feat)
    assert wo.shape == (16, feat)

    tn = _choose_tile(n, tile_n)
    grid = (n // tn,)

    # Wrapper-side layout plumbing (tiny XLA ops on narrow arrays).
    xt = x.T                                 # (4, N): contiguous rows for DMA
    b1c = b1.reshape(feat, 1)
    bhc = bh.reshape(num_layers, feat, 1)
    boc = bo.reshape(16, 1)

    # Advisory cost estimate (matmuls dominate; cos + sqrt/rsqrt go to the EUP).
    flops = int(2 * n * (in_dim * feat + num_layers * feat * feat + feat * 16)
                + 9 * n * num_bh)
    transcendentals = int(n * (2 * num_bh + num_layers * feat))
    weight_bytes = 4 * (feat * in_dim + num_layers * feat * feat + 16 * feat
                        + (num_layers + 1) * feat + 16 + 3 * num_bh)
    bytes_accessed = int(4 * n * (4 + 16) + weight_bytes)

    out_t = pl.pallas_call(
        tetrad_v2_kernel,
        out_shape=jax.ShapeDtypeStruct((16, n), jnp.float32),
        grid=grid,
        in_specs=[
            pl.BlockSpec((4, tn), lambda i: (0, i)),                      # x^T
            pl.BlockSpec((num_bh, 3), lambda i: (0, 0)),                  # BH pos
            pl.BlockSpec((feat, in_dim), lambda i: (0, 0)),               # W1
            pl.BlockSpec((feat, 1), lambda i: (0, 0)),                    # b1
            pl.BlockSpec((num_layers, feat, feat), lambda i: (0, 0, 0)),  # hidden W
            pl.BlockSpec((num_layers, feat, 1), lambda i: (0, 0, 0)),     # hidden b
            pl.BlockSpec((16, feat), lambda i: (0, 0)),                   # W_out
            pl.BlockSpec((16, 1), lambda i: (0, 0)),                      # b_out
        ],
        out_specs=pl.BlockSpec((16, tn), lambda i: (0, i)),
        compiler_params=pltpu.CompilerParams(
            dimension_semantics=("parallel",),
            vmem_limit_bytes=32 * 1024 * 1024),
        cost_estimate=pl.CostEstimate(
            flops=flops, transcendentals=transcendentals,
            bytes_accessed=bytes_accessed),
    )(xt, pos, w1, b1c, wh, bhc, wo, boc)

    # (16, N) -> (N, 16) -> (N, 4, 4); the transpose is a tiny XLA op.
    return out_t.T.reshape(n, 4, 4)


def _reference(x, pos, w1, b1, wh, bh, wo, bo):
    """Pure-JAX reference mirroring the PyTorch forward exactly."""
    hp = lax.Precision.HIGHEST
    xyz = x[:, 1:4]
    diff = xyz[:, None, :] - pos[None, :, :]             # (N, NB, 3)
    r = jnp.sqrt(jnp.sum(diff * diff, axis=2))           # (N, NB)
    feat = jnp.concatenate([x, r, 1.0 / r], axis=1)      # (N, 4+2NB)
    h = jnp.dot(feat, w1.T, precision=hp) + b1
    for l in range(wh.shape[0]):
        h = jnp.cos(jnp.dot(h, wh[l].T, precision=hp) + bh[l])
    out = jnp.dot(h, wo.T, precision=hp) + bo
    return out.reshape(-1, 4, 4)


if __name__ == "__main__":
    key = jax.random.PRNGKey(0)
    n, num_bh, feature_size, num_layers = 256, 2, 32, 2
    in_dim = 4 + 2 * num_bh

    keys = jax.random.split(key, 9)

    # Black-hole positions well away from the sample points so r > 0.
    pos = jax.random.uniform(keys[0], (num_bh, 3), jnp.float32, 5.0, 10.0)
    t = jax.random.uniform(keys[1], (n, 1), jnp.float32, 0.0, 1.0)
    xyz = jax.random.uniform(keys[2], (n, 3), jnp.float32, -3.0, 3.0)
    x = jnp.concatenate([t, xyz], axis=1)                # (N, 4)

    def xavier(k, fan_out, fan_in):
        lim = (6.0 / (fan_in + fan_out)) ** 0.5
        return jax.random.uniform(k, (fan_out, fan_in), jnp.float32, -lim, lim)

    # Weights in native PyTorch (out_features, in_features) layout.
    w1 = xavier(keys[3], feature_size, in_dim)
    b1 = 0.1 * jax.random.normal(keys[4], (feature_size,), jnp.float32)
    wh = jnp.stack([xavier(k, feature_size, feature_size)
                    for k in jax.random.split(keys[5], num_layers)])
    bh = 0.1 * jax.random.normal(keys[6], (num_layers, feature_size), jnp.float32)
    wo = xavier(keys[7], 16, feature_size)
    bo = 0.1 * jax.random.normal(keys[8], (16,), jnp.float32)

    e = tetrad_network_v2(x, pos, w1, b1, wh, bh, wo, bo)
    jax.block_until_ready(e)

    ref = _reference(x, pos, w1, b1, wh, bh, wo, bo)
    assert e.shape == (n, 4, 4)
    max_err = jnp.max(jnp.abs(e - ref))
    assert jnp.allclose(e, ref, atol=1e-4, rtol=1e-4), \
        f"mismatch vs reference, max abs err = {max_err}"

    print("KERNEL_OK")
</pallas_src>

<mosaic_0001>
module attributes {stable_mosaic.version = 11 : i64} {
  func.func @tetrad_v2_kernel(%arg0: i32, %arg1: memref<4x128xf32, #tpu.memory_space<vmem>>, %arg2: memref<2x3xf32, #tpu.memory_space<vmem>>, %arg3: memref<32x8xf32, #tpu.memory_space<vmem>>, %arg4: memref<32x1xf32, #tpu.memory_space<vmem>>, %arg5: memref<2x32x32xf32, #tpu.memory_space<vmem>>, %arg6: memref<2x32x1xf32, #tpu.memory_space<vmem>>, %arg7: memref<16x32xf32, #tpu.memory_space<vmem>>, %arg8: memref<16x1xf32, #tpu.memory_space<vmem>>, %arg9: memref<16x128xf32, #tpu.memory_space<vmem>>) attributes {dimension_semantics = [#tpu.dimension_semantics<parallel>], iteration_bounds = array<i64: 2>, scalar_prefetch = 0 : i64, scratch_operands = 0 : i64, tpu.core_type = #tpu.core_type<tc>, window_params = [{transform_indices = @transform_0, window_bounds = array<i64: 4, 128>}, {pipeline_mode = #tpu.pipeline_mode<synchronous>, transform_indices = @transform_1, window_bounds = array<i64: 2, 3>}, {pipeline_mode = #tpu.pipeline_mode<synchronous>, transform_indices = @transform_2, window_bounds = array<i64: 32, 8>}, {pipeline_mode = #tpu.pipeline_mode<synchronous>, transform_indices = @transform_3, window_bounds = array<i64: 32, 1>}, {pipeline_mode = #tpu.pipeline_mode<synchronous>, transform_indices = @transform_4, window_bounds = array<i64: 2, 32, 32>}, {pipeline_mode = #tpu.pipeline_mode<synchronous>, transform_indices = @transform_5, window_bounds = array<i64: 2, 32, 1>}, {pipeline_mode = #tpu.pipeline_mode<synchronous>, transform_indices = @transform_6, window_bounds = array<i64: 16, 32>}, {pipeline_mode = #tpu.pipeline_mode<synchronous>, transform_indices = @transform_7, window_bounds = array<i64: 16, 1>}, {transform_indices = @transform_8, window_bounds = array<i64: 16, 128>}]} {
    %c0 = arith.constant 0 : index
    %c0_0 = arith.constant 0 : index
    %0 = vector.load %arg1[%c0, %c0_0] : memref<4x128xf32, #tpu.memory_space<vmem>>, vector<4x128xf32>
    %c0_1 = arith.constant 0 : index
    %c0_2 = arith.constant 0 : index
    %1 = vector.load %arg2[%c0_1, %c0_2] : memref<2x3xf32, #tpu.memory_space<vmem>>, vector<2x3xf32>
    %2 = vector.extract_strided_slice %0 {offsets = [1, 0], sizes = [1, 128], strides = [1, 1]} : vector<4x128xf32> to vector<1x128xf32>
    %3 = vector.extract_strided_slice %1 {offsets = [0, 0], sizes = [2, 1], strides = [1, 1]} : vector<2x3xf32> to vector<2x1xf32>
    %4 = vector.broadcast %2 : vector<1x128xf32> to vector<2x128xf32>
    %5 = vector.broadcast %3 : vector<2x1xf32> to vector<2x128xf32>
    %6 = arith.subf %4, %5 : vector<2x128xf32>
    %7 = vector.extract_strided_slice %0 {offsets = [2, 0], sizes = [1, 128], strides = [1, 1]} : vector<4x128xf32> to vector<1x128xf32>
    %8 = vector.extract_strided_slice %1 {offsets = [0, 1], sizes = [2, 1], strides = [1, 1]} : vector<2x3xf32> to vector<2x1xf32>
    %9 = vector.broadcast %7 : vector<1x128xf32> to vector<2x128xf32>
    %10 = vector.broadcast %8 : vector<2x1xf32> to vector<2x128xf32>
    %11 = arith.subf %9, %10 : vector<2x128xf32>
    %12 = vector.extract_strided_slice %0 {offsets = [3, 0], sizes = [1, 128], strides = [1, 1]} : vector<4x128xf32> to vector<1x128xf32>
    %13 = vector.extract_strided_slice %1 {offsets = [0, 2], sizes = [2, 1], strides = [1, 1]} : vector<2x3xf32> to vector<2x1xf32>
    %14 = vector.broadcast %12 : vector<1x128xf32> to vector<2x128xf32>
    %15 = vector.broadcast %13 : vector<2x1xf32> to vector<2x128xf32>
    %16 = arith.subf %14, %15 : vector<2x128xf32>
    %17 = arith.mulf %6, %6 : vector<2x128xf32>
    %18 = arith.mulf %11, %11 : vector<2x128xf32>
    %19 = arith.addf %17, %18 : vector<2x128xf32>
    %20 = arith.mulf %16, %16 : vector<2x128xf32>
    %21 = arith.addf %19, %20 : vector<2x128xf32>
    %22 = math.sqrt %21 : vector<2x128xf32>
    %23 = math.rsqrt %21 : vector<2x128xf32>
    %24 = tpu.concatenate %0, %22, %23 in 0 : vector<4x128xf32>, vector<2x128xf32>, vector<2x128xf32> -> vector<8x128xf32>
    %c0_3 = arith.constant 0 : index
    %c0_4 = arith.constant 0 : index
    %25 = vector.load %arg3[%c0_3, %c0_4] : memref<32x8xf32, #tpu.memory_space<vmem>>, vector<32x8xf32>
    %cst = arith.constant dense<0.000000e+00> : vector<32x128xf32>
    %26 = tpu.matmul %25, %24, %cst {dimension_numbers = #tpu.dot_dimension_numbers<[1], [0], [0], [1], [0, 0, 1, 1], [], []>, precision = #tpu.contract_precision<fp32>} : vector<32x8xf32>, vector<8x128xf32>, vector<32x128xf32> -> vector<32x128xf32>
    %c0_5 = arith.constant 0 : index
    %c0_6 = arith.constant 0 : index
    %27 = vector.load %arg4[%c0_5, %c0_6] : memref<32x1xf32, #tpu.memory_space<vmem>>, vector<32x1xf32>
    %28 = vector.broadcast %27 : vector<32x1xf32> to vector<32x128xf32>
    %29 = arith.addf %26, %28 : vector<32x128xf32>
    %c0_7 = arith.constant 0 : index
    %c0_8 = arith.constant 0 : index
    %c0_9 = arith.constant 0 : index
    %30 = vector.load %arg5[%c0_7, %c0_8, %c0_9] : memref<2x32x32xf32, #tpu.memory_space<vmem>>, vector<1x32x32xf32>
    %31 = vector.shape_cast %30 : vector<1x32x32xf32> to vector<32x32xf32>
    %cst_10 = arith.constant dense<0.000000e+00> : vector<32x128xf32>
    %32 = tpu.matmul %31, %29, %cst_10 {dimension_numbers = #tpu.dot_dimension_numbers<[1], [0], [0], [1], [0, 0, 1, 1], [], []>, precision = #tpu.contract_precision<fp32>} : vector<32x32xf32>, vector<32x128xf32>, vector<32x128xf32> -> vector<32x128xf32>
    %c0_11 = arith.constant 0 : index
    %c0_12 = arith.constant 0 : index
    %c0_13 = arith.constant 0 : index
    %33 = vector.load %arg6[%c0_11, %c0_12, %c0_13] : memref<2x32x1xf32, #tpu.memory_space<vmem>>, vector<1x32x1xf32>
    %34 = vector.shape_cast %33 : vector<1x32x1xf32> to vector<32x1xf32>
    %35 = vector.broadcast %34 : vector<32x1xf32> to vector<32x128xf32>
    %36 = arith.addf %32, %35 : vector<32x128xf32>
    %37 = math.cos %36 : vector<32x128xf32>
    %c1 = arith.constant 1 : index
    %c0_14 = arith.constant 0 : index
    %c0_15 = arith.constant 0 : index
    %38 = vector.load %arg5[%c1, %c0_14, %c0_15] : memref<2x32x32xf32, #tpu.memory_space<vmem>>, vector<1x32x32xf32>
    %39 = vector.shape_cast %38 : vector<1x32x32xf32> to vector<32x32xf32>
    %cst_16 = arith.constant dense<0.000000e+00> : vector<32x128xf32>
    %40 = tpu.matmul %39, %37, %cst_16 {dimension_numbers = #tpu.dot_dimension_numbers<[1], [0], [0], [1], [0, 0, 1, 1], [], []>, precision = #tpu.contract_precision<fp32>} : vector<32x32xf32>, vector<32x128xf32>, vector<32x128xf32> -> vector<32x128xf32>
    %c1_17 = arith.constant 1 : index
    %c0_18 = arith.constant 0 : index
    %c0_19 = arith.constant 0 : index
    %41 = vector.load %arg6[%c1_17, %c0_18, %c0_19] : memref<2x32x1xf32, #tpu.memory_space<vmem>>, vector<1x32x1xf32>
    %42 = vector.shape_cast %41 : vector<1x32x1xf32> to vector<32x1xf32>
    %43 = vector.broadcast %42 : vector<32x1xf32> to vector<32x128xf32>
    %44 = arith.addf %40, %43 : vector<32x128xf32>
    %45 = math.cos %44 : vector<32x128xf32>
    %c0_20 = arith.constant 0 : index
    %c0_21 = arith.constant 0 : index
    %46 = vector.load %arg7[%c0_20, %c0_21] : memref<16x32xf32, #tpu.memory_space<vmem>>, vector<16x32xf32>
    %cst_22 = arith.constant dense<0.000000e+00> : vector<16x128xf32>
    %47 = tpu.matmul %46, %45, %cst_22 {dimension_numbers = #tpu.dot_dimension_numbers<[1], [0], [0], [1], [0, 0, 1, 1], [], []>, precision = #tpu.contract_precision<fp32>} : vector<16x32xf32>, vector<32x128xf32>, vector<16x128xf32> -> vector<16x128xf32>
    %c0_23 = arith.constant 0 : index
    %c0_24 = arith.constant 0 : index
    %48 = vector.load %arg8[%c0_23, %c0_24] : memref<16x1xf32, #tpu.memory_space<vmem>>, vector<16x1xf32>
    %49 = vector.broadcast %48 : vector<16x1xf32> to vector<16x128xf32>
    %50 = arith.addf %47, %49 : vector<16x128xf32>
    %c0_25 = arith.constant 0 : index
    %c0_26 = arith.constant 0 : index
    %51 = vector.load %arg9[%c0_25, %c0_26] : memref<16x128xf32, #tpu.memory_space<vmem>>, vector<16x128xf32>
    tpu.vector_store %arg9[%c0_25, %c0_26], %50 {strides = array<i32>} : memref<16x128xf32, #tpu.memory_space<vmem>>, vector<16x128xf32>,
    return
  }
  func.func @transform_0(%arg0: i32) -> (i32, i32) {
    %c0_i32 = arith.constant 0 : i32
    %c0_i32_0 = arith.constant 0 : i32
    return %c0_i32, %arg0 : i32, i32
  }
  func.func @transform_1(%arg0: i32) -> (i32, i32) {
    %c0_i32 = arith.constant 0 : i32
    %c0_i32_0 = arith.constant 0 : i32
    %c0_i32_1 = arith.constant 0 : i32
    return %c0_i32, %c0_i32_0 : i32, i32
  }
  func.func @transform_2(%arg0: i32) -> (i32, i32) {
    %c0_i32 = arith.constant 0 : i32
    %c0_i32_0 = arith.constant 0 : i32
    %c0_i32_1 = arith.constant 0 : i32
    return %c0_i32, %c0_i32_0 : i32, i32
  }
  func.func @transform_3(%arg0: i32) -> (i32, i32) {
    %c0_i32 = arith.constant 0 : i32
    %c0_i32_0 = arith.constant 0 : i32
    %c0_i32_1 = arith.constant 0 : i32
    return %c0_i32, %c0_i32_0 : i32, i32
  }
  func.func @transform_4(%arg0: i32) -> (i32, i32, i32) {
    %c0_i32 = arith.constant 0 : i32
    %c0_i32_0 = arith.constant 0 : i32
    %c0_i32_1 = arith.constant 0 : i32
    %c0_i32_2 = arith.constant 0 : i32
    return %c0_i32, %c0_i32_0, %c0_i32_1 : i32, i32, i32
  }
  func.func @transform_5(%arg0: i32) -> (i32, i32, i32) {
    %c0_i32 = arith.constant 0 : i32
    %c0_i32_0 = arith.constant 0 : i32
    %c0_i32_1 = arith.constant 0 : i32
    %c0_i32_2 = arith.constant 0 : i32
    return %c0_i32, %c0_i32_0, %c0_i32_1 : i32, i32, i32
  }
  func.func @transform_6(%arg0: i32) -> (i32, i32) {
    %c0_i32 = arith.constant 0 : i32
    %c0_i32_0 = arith.constant 0 : i32
    %c0_i32_1 = arith.constant 0 : i32
    return %c0_i32, %c0_i32_0 : i32, i32
  }
  func.func @transform_7(%arg0: i32) -> (i32, i32) {
    %c0_i32 = arith.constant 0 : i32
    %c0_i32_0 = arith.constant 0 : i32
    %c0_i32_1 = arith.constant 0 : i32
    return %c0_i32, %c0_i32_0 : i32, i32
  }
  func.func @transform_8(%arg0: i32) -> (i32, i32) {
    %c0_i32 = arith.constant 0 : i32
    %c0_i32_0 = arith.constant 0 : i32
    return %c0_i32, %arg0 : i32, i32
  }
}

</mosaic_0001>

<bundles_post_ra>
// kernel: tpu_custom_call.1
= control target key start
LH: loop header
LB: loop body
LE: loop exit
PB: predicated region body
PF: predicated region fallthrough
CT: control target
= control target key end

     0   :  { %13 = vsyncpa [#allocation3], 0  ;;  %s5777_s0 = inlined_call_operand.vmem [shape: f32[4,256], index: 0, kind: input, shape index: {}]   ;;  %s5778_s1 = inlined_call_operand.vmem [shape: f32[2,3], index: 1, kind: input, shape index: {}]   ;;  %s5779_s2 = inlined_call_operand.vmem [shape: f32[32,8], index: 2, kind: input, shape index: {}]   ;;  %s5780_s3 = inlined_call_operand.vmem [shape: f32[32,1], index: 3, kind: input, shape index: {}]   ;;  %s5781_s4 = inlined_call_operand.vmem [shape: f32[2,32,32], index: 4, kind: input, shape index: {}]   ;;  %s5782_s5 = inlined_call_operand.vmem [shape: f32[2,32,1], index: 5, kind: input, shape index: {}]   ;;  %s5783_s6 = inlined_call_operand.vmem [shape: f32[16,32], index: 6, kind: input, shape index: {}]   ;;  %s5784_s7 = inlined_call_operand.vmem [shape: f32[16,1], index: 7, kind: input, shape index: {}]   ;;  %s5785_s8 = inlined_call_operand.hbm [shape: f32[16,256], index: 8, kind: output, shape index: {}]  }
   0x1   :  { %15 = vsyncpa [#allocation3 + $0x1], 0  ;;  %s4696_s27 = smov 0   ;;  %s4698_s28 = smov 0  }
   0x2   :  { %s4700_s29 = smov 0   ;;  %s4702_s30 = smov 0  }
   0x3 LB: > { %s4717_s9 = sadd.s32 4294967295, %s4636_s30   ;;  %s3730_s10 = sadd.s32 4294967294, %s4636_s30   ;;  %s4636_s30 = sphi %s4702_s30, %s5807_s30   ;;  %s4632_s29 = sphi %s4700_s29, %s5806_s29   ;;  %s4628_s28 = sphi %s4698_s28, %s5805_s28   ;;  %s4624_s27 = sphi %s4696_s27, %s5804_s27  }
   0x4   : > { %s4721_s11 = sadd.s32 1, %s4636_s30   ;;  %s201_s12 = sadd.s32 1, %s4632_s29 }
   0x5   : > { %s198_s13 = ssub.s32 %s4636_s30, %s4721_s11  ;;  %p211_p0 = scmp.ne.s32.totalorder %s4632_s29, %s4628_s28 }
   0x6   : > { %p199_p1 = scmp.eq.s32.totalorder %s198_s13, 0  ;;  %p212_p2 = scmp.eq.s32.totalorder %s4717_s9, 1 }
   0x7   : > { %p217_p3 = scmp.ne.s32.totalorder %s4628_s28, %s4624_s27  ;;  %p218_p4 = scmp.eq.s32.totalorder %s3730_s10, 1 }
   0x8   : > { %s4732_s14 = scalar_select %p199_p1, %s4632_s29, %s201_s12  }
   0x9   : > { %p4734_p5 = por %p212_p2, %p211_p0  ;;  %p4738_p6 = por %p218_p4, %p217_p3 }
   0xa   : > { %p3733_p7 = scmp.ge.s32.totalorder %s4636_s30, 1  ;;  %p264_p8 = scmp.lt.s32.totalorder %s4636_s30, 3 }
   0xc   : > { %p265_p9 = pnand %p3733_p7, %p264_p8 }
   0xd   : > { %v302_v0 = vld [vmem:[%s5778_s1] sm:$0x3] (!%p265_p9)  ;;  %v4638_v1 = vmov (!%p265_p9), 0   ;;  %v4639_v2 = vmov (!%p265_p9), 2   ;;  %v4640_v3 = vmov (!%p265_p9), 1   ;;  %vm382_vm0 = vcmask (!%p265_p9), 64512  }
   0xe   : > { %268 = sbr.rel (%p265_p9) target bundleno = 1513 (0x5e9), region = 52  ;;  %4535 = vset.pattern.permute.xlu0 (!%p265_p9), %v4638_v1  ;;  %4537 = vset.pattern.permute.xlu1 (!%p265_p9), %v4639_v2  ;;  %v354_v4 = vld [vmem:[%s5779_s2] sm:$0xff] (!%p265_p9)  ;;  %v360_v12 = vld [vmem:[%s5780_s3 + $0x10] sm:$0xff] (!%p265_p9)  ;;  %v359_v13 = vld [vmem:[%s5780_s3 + $0x8] sm:$0xff] (!%p265_p9)  ;;  %p297_p10 = scmp.lt.s32.totalorder (!%p265_p9), %s4717_s9, 1  ;;  %v303_v25 = vlaneseq (!%p265_p9)  ;;  %vm350_vm3 = vcmask (!%p265_p9), 1043456  }
   0xf   : > { %309 = vperm.xlu0 (!%p265_p9), %4535, %v302_v0   ;;  %327 = vperm.xlu1 (!%p265_p9), %4537, %v302_v0   ;;  %v384_v5 = vsel (!%p265_p9), %vm382_vm0, %v354_v4, 0  ;;  %v358_v11 = vld [vmem:[%s5780_s3] sm:$0xff] (!%p265_p9)  ;;  %v975_v14 = vld [vmem:[%s5782_s5 + $0x8] sm:$0xff] (!%p265_p9)  ;;  %v361_v15 = vld [vmem:[%s5780_s3 + $0x18] sm:$0xff] (!%p265_p9)  ;;  %vm352_vm4 = vcmask (!%p265_p9), 1045504   ;;  %vm998_vm5 = vcmask (!%p265_p9), 261120  }
  0x10   : > { %v4751_v6 = vand.u32 (!%p265_p9), 4294901760, %v384_v5  ;;  %v977_v16 = vld [vmem:[%s5782_s5 + $0x18] sm:$0xff] (!%p265_p9)  ;;  %v974_v17 = vld [vmem:[%s5782_s5] sm:$0xff] (!%p265_p9)  ;;  %v3757_v18 = vld [vmem:[%s5782_s5 + $0x28] sm:$0xff] (!%p265_p9)  ;;  %v304_v26 = vshrl.u32 (!%p265_p9), %v303_v25, 7  ;;  %s294_s12 = sand.u32 (!%p265_p9), 1, %s4628_s28  }
  0x11   : > { %v976_v19 = vld [vmem:[%s5782_s5 + $0x10] sm:$0xff] (!%p265_p9)  ;;  %v3759_v20 = vld [vmem:[%s5782_s5 + $0x38] sm:$0xff] (!%p265_p9)  ;;  %v3756_v21 = vld [vmem:[%s5782_s5 + $0x20] sm:$0xff] (!%p265_p9)  ;;  %s3734_s13 = sshll.u32 (!%p265_p9), %s294_s12, 4  ;;  %s3777_s19 = sshll.u32 (!%p265_p9), %s4717_s9, 7 }
  0x12   : > { %v4754_v7 = vsub.f32 (!%p265_p9), %v384_v5, %v4751_v6  ;;  %v3108_v22 = vld [vmem:[%s5784_s7 + $0x8] sm:$0xff] (!%p265_p9)  ;;  %v3758_v23 = vld [vmem:[%s5782_s5 + $0x30] sm:$0xff] (!%p265_p9)  ;;  %v3107_v24 = vld [vmem:[%s5784_s7] sm:$0xff] (!%p265_p9)  ;;  %v305_v27 = vsub.s32 (!%p265_p9), 1, %v304_v26  ;;  %v324_v28 = vsub.s32 (!%p265_p9), 3, %v304_v26  ;;  %v315_v30 = vsub.s32 (!%p265_p9), 2, %v304_v26  ;;  %s5734_s22 = scalar_lea.hbm (!%p265_p9), %s5785_s8, %s3777_s19 }
  0x13   : > { %4536 = vset.pattern.permute.xlu0 (!%p265_p9), %v4640_v3  ;;  %4538 = vset.pattern.permute.xlu1 (!%p265_p9), %v4638_v1  ;;  %v355_v44 = vld [vmem:[%s5779_s2 + $0x8] sm:$0xff] (!%p265_p9)  ;;  %v356_v46 = vld [vmem:[%s5779_s2 + $0x10] sm:$0xff] (!%p265_p9)  ;;  %v357_v49 = vld [vmem:[%s5779_s2 + $0x18] sm:$0xff] (!%p265_p9)  ;;  %s296_s17 = scalar_lea.vmem (!%p265_p9), [#allocation2], %s3734_s13 }
  0x14   : > { %318 = vperm.xlu0 (!%p265_p9), %4536, %v302_v0   ;;  %v463_v8 = vand.u32 (!%p265_p9), 4294901760, %v4754_v7  ;;  %364 = vperm.xlu1 (!%p265_p9), %4538, %v358_v11   ;;  %v387_v47 = vsel (!%p265_p9), %vm382_vm0, %v355_v44, 0  ;;  %v390_v48 = vsel (!%p265_p9), %vm382_vm0, %v356_v46, 0  ;;  %v393_v52 = vsel (!%p265_p9), %vm382_vm0, %v357_v49, 0  ;;  %s3668_s18 = sshll.u32 (!%p265_p9), %s296_s17, 4  ;;  %s5729_s18 = int_to_ptr.vmem [resolvable:$true] %s3668_s18 }
  0x15   : > { %s298_s23 = scalar_select %p297_p10, %s4717_s9, 1  ;;  %v4818_v50 = vand.u32 4294901760, %v387_v47  ;;  %v4820_v51 = vand.u32 4294901760, %v390_v48  ;;  %v4824_v54 = vand.u32 4294901760, %v393_v52 }
  0x16   : > { %v464_v9 = vsub.f32 %v4754_v7, %v463_v8  ;;  %s4574_s9 = scalar_lea.vmem %s5729_s18, 256 }
  0x17   : > { %s3735_s24 = sshll.u32 %s298_s23, 2  ;;  %v472_v53 = vsub.f32 %v387_v47, %v4818_v50  ;;  %v482_v55 = vsub.f32 %v390_v48, %v4820_v51  ;;  %v492_v59 = vsub.f32 %v393_v52, %v4824_v54  ;;  %s5736_s23 = scalar_lea.sflag [#allocation3], %s294_s12 }
  0x18   : > { %4539 = vset.pattern.permute.xlu0 %v4638_v1  ;;  %v465_v10 = vand.u32 4294901760, %v464_v9  ;;  %369 = vperm.xlu1 %4538, %v359_v13   ;;  %s300_s10 = scalar_lea.vmem %s5777_s0, %s3735_s24  ;;  %p4575_p11 = scmp.ne.s32.totalorder %s5729_s18, %s4574_s9 }
  0x19   : > { %374 = vperm.xlu0 %4539, %v360_v12   ;;  %v301_v29 = vld [vmem:[%s300_s10] sm:$0xf]  ;;  %v473_v58 = vand.u32 4294901760, %v472_v53  ;;  %v483_v61 = vand.u32 4294901760, %v482_v55  ;;  %v493_v2 = vand.u32 4294901760, %v492_v59  ;;  %s4647_s24 = smov [#allocation2]  }
  0x1a   : > { %3944 = vmatprep.mubr.f32.mxu0 %v465_v10  ;;  %v306_v32 = vrot.slane %v301_v29, %v305_v27  ;;  %v325_v33 = vrot.slane %v301_v29, %v324_v28  ;;  %v316_v35 = vrot.slane %v301_v29, %v315_v30  ;;  %v973_v28 = vld [vmem:[%s5781_s4 + $0x18] sm:$0xff]  ;;  %p4576_p12 = pnand %p4575_p11, %p4734_p5  ;;  %s4578_s25 = sshll.u32 %s4647_s24, 4  ;;  %s4579_s25 = int_to_ptr.vmem [resolvable:$false] %s4578_s25 }
  0x1b   : > { %v474_v1 = vsub.f32 %v472_v53, %v473_v58  ;;  %v484_v4 = vsub.f32 %v482_v55, %v483_v61  ;;  %v494_v12 = vsub.f32 %v492_v59, %v493_v2  ;;  %s4580_s26 = scalar_lea.vmem %s4579_s25, 512  ;;  %p4581_p0 = scmp.lt.s32.totalorder %s5729_s18, %s4579_s25 }
  0x1c   : > { %379 = vperm.xlu1 %4538, %v361_v15   ;;  %p4577_p13 = pneg %p4576_p12  ;;  %p4582_p1 = scmp.lt.s32.totalorder %s4580_s26, %s4574_s9 }
  0x1d   : > { %985 = vperm.xlu0 %4539, %v975_v14   ;;  %v475_v11 = vand.u32 4294901760, %v474_v1  ;;  %v485_v13 = vand.u32 4294901760, %v484_v4  ;;  %v495_v15 = vand.u32 4294901760, %v494_v12 }
  0x1e   : > { %p4583_p2 = por %p4582_p1, %p4581_p0 }
  0x20   : > { %980 = vperm.xlu1 %4538, %v974_v17   ;;  %p4584_p3 = pnand %p4583_p2, %p4577_p13 }
  0x21   : > { %995 = vperm.xlu0 %4539, %v977_v16  }
  0x24   : > { %990 = vperm.xlu1 %4538, %v976_v19  }
  0x25   : > { %2054 = vperm.xlu0 %4539, %v3757_v18  }
  0x28   : > { %2049 = vperm.xlu1 %4538, %v3756_v21  }
  0x29   : > { %2064 = vperm.xlu0 %4539, %v3759_v20  }
  0x2c   : > { %2059 = vperm.xlu1 %4538, %v3758_v23   ;;  %v971_v23 = vld [vmem:[%s5781_s4 + $0x8] sm:$0xff] }
  0x2d   : > { %3116 = vperm.xlu0 %4539, %v3108_v22   ;;  %v1003_v26 = vsel %vm998_vm5, %v971_v23, 0 }
  0x30   : > { %3111 = vperm.xlu1 %4538, %v3107_v24   ;;  %v972_v24 = vld [vmem:[%s5781_s4 + $0x10] sm:$0xff] }
  0x31   : > { %v1006_v27 = vsel %vm998_vm5, %v972_v24, 0 }
  0x32   : > { %v4869_v30 = vand.u32 4294901760, %v1006_v27 }
  0x8e   : > { %v310_v31 = vpop.permute.xlu0 %309  ;;  %v328_v34 = vpop.permute.xlu1 %327 }
  0x8f   : > { %v312_v36 = vsub.f32 %v306_v32, %v310_v31  ;;  %v330_v37 = vsub.f32 %v325_v33, %v328_v34  ;;  %v1009_v31 = vsel %vm998_vm5, %v973_v28, 0 }
  0x91   : > { %v331_v40 = vmul.f32 %v312_v36, %v312_v36  ;;  %v334_v42 = vmul.f32 %v330_v37, %v330_v37 }
  0x93   : > { %v319_v38 = vpop.permute.xlu0 %318  ;;  %v365_v25 = vpop.permute.xlu1 %364 }
  0x94   : > { %v321_v39 = vsub.f32 %v316_v35, %v319_v38  ;;  %v4875_v35 = vand.u32 4294901760, %v1009_v31  ;;  %v4878_v38 = vsub.f32 %v1006_v27, %v4869_v30 }
  0x96   : > { %v332_v41 = vmul.f32 %v321_v39, %v321_v39 }
  0x97   : > { %v370_v32 = vpop.permute.xlu1 %369 }
  0x98   : > { %v333_v43 = vadd.f32 %v332_v41, %v331_v40  ;;  %v375_v46 = vpop.permute.xlu0 %374 }
  0x9a   : > { %v335_v45 = vadd.f32 %v334_v42, %v333_v43 }
  0x9b   : > { %v380_v42 = vpop.permute.xlu1 %379 }
  0x9c   : > { %4540 = vrsqrt.f32 %v335_v45  ;;  %vm338_vm1 = vcmp.eq.f32.partialorder %v335_v45, inf  ;;  %v341_v60 = vand.u32 2147483648, %v335_v45  ;;  %vm340_vm2 = vcmp.eq.f32.partialorder %v335_v45, 0.0 }
  0x9f   : > { %v981_v23 = vpop.permute.xlu1 %980 }
  0xa6   : > { %v4541_v56 = vpop.eup %4540 }
  0xa7   : > { %v337_v57 = vmul.f32 %v4541_v56, %v335_v45  ;;  %v348_v3 = vrot.slane %v4541_v56, 2 }
  0xa9   : > { %v339_v62 = vsel %vm338_vm1, %v335_v45, %v337_v57  ;;  %v4882_v45 = vsub.f32 %v1009_v31, %v4875_v35 }
  0xaa   : > { %v342_v63 = vsel %vm340_vm2, %v341_v60, %v339_v62 }
  0xab   : > { %v345_v0 = vrot.slane %v342_v63, 4 }
  0xad   : > { %v351_v5 = vsel %vm350_vm3, %v301_v29, %v345_v0  ;;  %v4867_v29 = vand.u32 4294901760, %v1003_v26 }
  0xae   : > { %v353_v9 = vsel %vm352_vm4, %v351_v5, %v348_v3 }
  0xaf   : > { %v396_v10 = vand.u32 4294901760, %v353_v9  ;;  %v4873_v33 = vsub.f32 %v1003_v26, %v4867_v29 }
  0xb1   : > { %3942 = vmatprep.subr.mxu0 %v396_v10  ;;  %v503_v14 = vsub.f32 %v353_v9, %v396_v10  ;;  %v1092_v41 = vand.u32 4294901760, %v4873_v33 }
  0xb2   : > { %3943 = vmatpush3.msra.mxu0 %v396_v10 }
  0xb3   : > { %3945 = vmatmul.mubr.f32.vlgmr.msra.gmra.mrb[0].mxu0 %v475_v11  ;;  %v504_v16 = vand.u32 4294901760, %v503_v14  ;;  %v1093_v56 = vsub.f32 %v4873_v33, %v1092_v41 }
  0xb4   : > { %3947 = vmatprep.mubr.f32.mxu0 %v485_v13 }
  0xb5   : > { %v505_v17 = vsub.f32 %v503_v14, %v504_v16  ;;  %v1094_v5 = vand.u32 4294901760, %v1093_v56 }
  0xb7   : > { %3948 = vmatmul.mubr.f32.gmra.mrb[2].mxu0 %v495_v15  ;;  %v506_v18 = vand.u32 4294901760, %v505_v17 }
  0xb8   : > { %3952 = vmatprep.mubr.f32.mxu0 %v4751_v6 }
  0xb9   : > { %3950 = vmatprep.subr.mxu0 %v506_v18 }
  0xba   : > { %3951 = vmatpush3.msra.mxu0 %v506_v18 }
  0xbb   : > { %3953 = vmatmul.mubr.f32.vlgmr.msra.gmra.mrb[0].mxu0 %v4818_v50  ;;  %3958 = vmatprep.subr.mxu0 %v503_v14 }
  0xbc   : > { %3959 = vmatpush3.msra.mxu0 %v503_v14  ;;  %3955 = vmatprep.mubr.f32.mxu0 %v4820_v51 }
  0xbd   : > { %3966 = vmatprep.subr.mxu0 %v396_v10 }
  0xbf   : > { %3956 = vmatmul.mubr.f32.gmra.mrb[2].mxu0 %v4824_v54 }
  0xc0   : > { %3960 = vmatprep.mubr.f32.mxu0 %v4754_v7  ;;  %v970_v7 = vld [vmem:[%s5781_s4] sm:$0xff] }
  0xc3   : > { %3961 = vmatmul.mubr.f32.vlgmr.msra.gmra.mrb[0].mxu0 %v472_v53 }
  0xc4   : > { %3967 = vmatpush3.msra.mxu0 %v396_v10  ;;  %3963 = vmatprep.mubr.f32.mxu0 %v482_v55 }
  0xc5   : > { %3974 = vmatprep.subr.mxu0 %v504_v16 }
  0xc7   : > { %3964 = vmatmul.mubr.f32.gmra.mrb[2].mxu0 %v492_v59  ;;  %v1112_v59 = vand.u32 4294901760, %v4882_v45 }
  0xc8   : > { %3968 = vmatprep.mubr.f32.mxu0 %v463_v8  ;;  %v1000_v8 = vsel %vm998_vm5, %v970_v7, 0 }
  0xc9   : > { %v4847_v19 = vand.u32 4294901760, %v1000_v8  ;;  %v1113_v12 = vsub.f32 %v4882_v45, %v1112_v59 }
  0xcb   : > { %3969 = vmatmul.mubr.f32.vlgmr.msra.gmra.mrb[0].mxu0 %v473_v58  ;;  %v4850_v20 = vsub.f32 %v1000_v8, %v4847_v19  ;;  %v1114_v8 = vand.u32 4294901760, %v1113_v12 }
  0xcc   : > { %3975 = vmatpush3.msra.mxu0 %v504_v16  ;;  %3971 = vmatprep.mubr.f32.mxu0 %v483_v61 }
  0xcd   : > { %3982 = vmatprep.subr.mxu0 %v396_v10 }
  0xcf   : > { %3972 = vmatmul.mubr.f32.gmra.mrb[2].mxu0 %v493_v2 }
  0xd0   : > { %3976 = vmatprep.mubr.f32.mxu0 %v4751_v6 }
  0xd3   : > { %3977 = vmatmul.mubr.f32.vlgmr.msra.gmra.mrb[0].mxu0 %v4818_v50 }
  0xd4   : > { %3983 = vmatpush3.msra.mxu0 %v396_v10  ;;  %3979 = vmatprep.mubr.f32.mxu0 %v4820_v51 }
  0xd7   : > { %3980 = vmatmul.mubr.f32.gmra.mrb[2].mxu0 %v4824_v54 }
  0xd8   : > { %3984 = vmatprep.mubr.f32.mxu0 %v4751_v6  ;;  %v1082_v6 = vand.u32 4294901760, %v4850_v20 }
  0xda   : > { %v1083_v21 = vsub.f32 %v4850_v20, %v1082_v6 }
  0xdb   : > { %3985 = vmatmul.mubr.f32.vlgmr.msra.gmra.mrb[0].mxu0 %v4818_v50  ;;  %v1102_v50 = vand.u32 4294901760, %v4878_v38 }
  0xdc   : > { %3987 = vmatprep.mubr.f32.mxu0 %v4820_v51  ;;  %v1084_v22 = vand.u32 4294901760, %v1083_v21 }
  0xdd   : > { %v1103_v63 = vsub.f32 %v4878_v38, %v1102_v50 }
  0xde   : > { %3998 = vmatprep.mubr.f32.mxu1 %v1084_v22 }
  0xdf   : > { %3988 = vmatmul.mubr.f32.gmra.mrb[2].mxu0 %v4824_v54  ;;  %v1104_v14 = vand.u32 4294901760, %v1103_v63 }
 0x1ae   : > { %v3986_v34 = vpop.f32.mrb[0].mxu0 }
 0x1af   : > { %v4368_v36 = vadd.f32 %v3986_v34, %v370_v32  ;;  %v948_v37 = vpop.f32.mrb[1].mxu0 }
 0x1b0   : > { %v4369_v39 = vadd.f32 %v948_v37, %v365_v25 }
 0x1b1   : > { %v1015_v40 = vand.u32 4294901760, %v4368_v36 }
 0x1b2   : > { %v1012_v43 = vand.u32 4294901760, %v4369_v39  ;;  %v3989_v44 = vpop.f32.mrb[2].mxu0 }
 0x1b3   : > { %v1129_v47 = vsub.f32 %v4368_v36, %v1015_v40  ;;  %v4370_v48 = vadd.f32 %v3989_v44, %v380_v42  ;;  %v960_v49 = vpop.f32.mrb[3].mxu0 }
 0x1b4   : > { %v4885_v51 = vpack.c.bf16 %v1015_v40, %v1012_v43  ;;  %v1122_v52 = vsub.f32 %v4369_v39, %v1012_v43  ;;  %v4371_v53 = vadd.f32 %v960_v49, %v375_v46  ;;  %v991_v46 = vpop.permute.xlu1 %990 }
 0x1b5   : > { %v1130_v54 = vand.u32 4294901760, %v1129_v47  ;;  %v1021_v55 = vand.u32 4294901760, %v4370_v48 }
 0x1b6   : > { %v1123_v57 = vand.u32 4294901760, %v1122_v52  ;;  %v1018_v58 = vand.u32 4294901760, %v4371_v53  ;;  %4225 = vmatprep.subr.bf16.mxu1 %v4885_v51  ;;  %v4240_v60 = vpack.c.bf16 %v1129_v47, %v1122_v52 }
 0x1b7   : > { %v1143_v61 = vsub.f32 %v4370_v48, %v1021_v55  ;;  %4227 = vmatpush3.bf16.msra.mxu1 %v4885_v51  ;;  %v1131_v62 = vsub.f32 %v1129_v47, %v1130_v54 }
 0x1b8   : > { %v4228_v0 = vpack.c.bf16 %v1021_v55, %v1018_v58  ;;  %v1136_v1 = vsub.f32 %v4371_v53, %v1018_v58  ;;  %v1124_v2 = vsub.f32 %v1122_v52, %v1123_v57  ;;  %v4256_v3 = vpack.c.bf16 %v1130_v54, %v1123_v57 }
 0x1b9   : > { %v1144_v4 = vand.u32 4294901760, %v1143_v61  ;;  %v1132_v9 = vand.u32 4294901760, %v1131_v62  ;;  %v4641_v58 = vmov 683565275   ;;  %v4642_v62 = vmov 2475754826  }
 0x1ba   : > { %v1137_v10 = vand.u32 4294901760, %v1136_v1  ;;  %4229 = vmatprep.subr.bf16.mxu1 %v4228_v0  ;;  %v1125_v11 = vand.u32 4294901760, %v1124_v2  ;;  %v4244_v13 = vpack.c.bf16 %v1143_v61, %v1136_v1  ;;  %v4644_v2 = vmov 2102212464  }
 0x1bb   : > { %4231 = vmatpush3.bf16.msra.mxu1 %v4228_v0  ;;  %v1145_v15 = vsub.f32 %v1143_v61, %v1144_v4 }
 0x1bc   : > { %v4232_v16 = vpack.c.bf16 %v1132_v9, %v1125_v11  ;;  %v1138_v17 = vsub.f32 %v1136_v1, %v1137_v10  ;;  %v4260_v18 = vpack.c.bf16 %v1144_v4, %v1137_v10  ;;  %v4645_v4 = vmov 920167782  }
 0x1bd   : > { %v1146_v7 = vand.u32 4294901760, %v1145_v15 }
 0x1be   : > { %3999 = vmatmul.mubr.f32.vlgmr.msra.gmra.mrb[0].mxu1 %v1094_v5  ;;  %4233 = vmatprep.subr.bf16.mxu1 %v4232_v16  ;;  %v1139_v21 = vand.u32 4294901760, %v1138_v17 }
 0x1bf   : > { %4235 = vmatpush3.bf16.msra.mxu1 %v4232_v16  ;;  %4001 = vmatprep.mubr.f32.mxu1 %v1104_v14  ;;  %v4646_v14 = vmov 1326507024  }
 0x1c0   : > { %v4236_v22 = vpack.c.bf16 %v1146_v7, %v1139_v21 }
 0x1c2   : > { %4002 = vmatmul.mubr.f32.gmra.mrb[2].mxu1 %v1114_v8  ;;  %4237 = vmatprep.subr.bf16.mxu1 %v4236_v22 }
 0x1c3   : > { %4239 = vmatpush3.bf16.msra.mxu1 %v4236_v22  ;;  %4012 = vmatprep.mubr.f32.mxu1 %v4847_v19 }
 0x1c4   : > { %4241 = vmatprep.subr.bf16.mxu1 %v4240_v60 }
 0x1c6   : > { %4013 = vmatmul.mubr.f32.vlgmr.msra.gmra.mrb[0].mxu1 %v4867_v29 }
 0x1c7   : > { %4243 = vmatpush3.bf16.msra.mxu1 %v4240_v60  ;;  %4015 = vmatprep.mubr.f32.mxu1 %v4869_v30 }
 0x1c8   : > { %4245 = vmatprep.subr.bf16.mxu1 %v4244_v13 }
 0x1ca   : > { %4016 = vmatmul.mubr.f32.gmra.mrb[2].mxu1 %v4875_v35 }
 0x1cb   : > { %4247 = vmatpush3.bf16.msra.mxu1 %v4244_v13  ;;  %4026 = vmatprep.mubr.f32.mxu1 %v4850_v20  ;;  %v986_v20 = vpop.permute.xlu0 %985 }
 0x1cc   : > { %4249 = vmatprep.subr.bf16.mxu1 %v4885_v51 }
 0x1ce   : > { %4027 = vmatmul.mubr.f32.vlgmr.msra.gmra.mrb[0].mxu1 %v4873_v33 }
 0x1cf   : > { %4251 = vmatpush3.bf16.msra.mxu1 %v4885_v51  ;;  %4029 = vmatprep.mubr.f32.mxu1 %v4878_v38  ;;  %v996_v31 = vpop.permute.xlu0 %995 }
 0x1d0   : > { %4253 = vmatprep.subr.bf16.mxu1 %v4228_v0 }
 0x1d2   : > { %4030 = vmatmul.mubr.f32.gmra.mrb[2].mxu1 %v4882_v45 }
 0x1d3   : > { %4255 = vmatpush3.bf16.msra.mxu1 %v4228_v0  ;;  %4040 = vmatprep.mubr.f32.mxu1 %v1082_v6 }
 0x1d4   : > { %4257 = vmatprep.subr.bf16.mxu1 %v4256_v3 }
 0x1d6   : > { %4041 = vmatmul.mubr.f32.vlgmr.msra.gmra.mrb[0].mxu1 %v1092_v41 }
 0x1d7   : > { %4259 = vmatpush3.bf16.msra.mxu1 %v4256_v3  ;;  %4043 = vmatprep.mubr.f32.mxu1 %v1102_v50 }
 0x1d8   : > { %4261 = vmatprep.subr.bf16.mxu1 %v4260_v18 }
 0x1da   : > { %4044 = vmatmul.mubr.f32.gmra.mrb[2].mxu1 %v1112_v59 }
 0x1db   : > { %4263 = vmatpush3.bf16.msra.mxu1 %v4260_v18  ;;  %4054 = vmatprep.mubr.f32.mxu1 %v4847_v19 }
 0x1dc   : > { %4265 = vmatprep.subr.bf16.mxu1 %v4885_v51 }
 0x1de   : > { %4055 = vmatmul.mubr.f32.vlgmr.msra.gmra.mrb[0].mxu1 %v4867_v29 }
 0x1df   : > { %4267 = vmatpush3.bf16.msra.mxu1 %v4885_v51  ;;  %4057 = vmatprep.mubr.f32.mxu1 %v4869_v30 }
 0x1e0   : > { %4269 = vmatprep.subr.bf16.mxu1 %v4228_v0 }
 0x1e2   : > { %4058 = vmatmul.mubr.f32.gmra.mrb[2].mxu1 %v4875_v35 }
 0x1e3   : > { %4271 = vmatpush3.bf16.msra.mxu1 %v4228_v0  ;;  %4068 = vmatprep.mubr.f32.mxu1 %v4847_v19  ;;  %v4643_v0 = vmov 2131351028  }
 0x1e6   : > { %4069 = vmatmul.mubr.f32.vlgmr.msra.gmra.mrb[0].mxu1 %v4867_v29 }
 0x1e7   : > { %4071 = vmatprep.mubr.f32.mxu1 %v4869_v30 }
 0x1ea   : > { %4072 = vmatmul.mubr.f32.gmra.mrb[2].mxu1 %v4875_v35 }
 0x2b9   : > { %v4070_v6 = vpop.f32.mrb[0].mxu1 }
 0x2ba   : > { %v4923_v24 = vadd.f32 %v4070_v6, %v986_v20  ;;  %v1603_v25 = vpop.f32.mrb[1].mxu1 }
 0x2bb   : > { %v4925_v26 = vadd.f32 %v1603_v25, %v981_v23 }
 0x2bc   : > { %v1728_v27 = vand.u32 2147483647, %v4923_v24  ;;  %v1731_v28 = vand.u32 2139095040, %v4923_v24  ;;  %vm1730_vm3 = vcmp.lt.s32.totalorder %v4923_v24, 0 }
 0x2bd   : > { %v1625_v19 = vand.u32 2147483647, %v4925_v26  ;;  %v1628_v29 = vand.u32 2139095040, %v4925_v26  ;;  %v4073_v30 = vpop.f32.mrb[2].mxu1 }
 0x2be   : > { %v1732_v32 = vshrl.u32 %v1731_v28, 23  ;;  %v4931_v33 = vadd.f32 %v4073_v30, %v996_v31  ;;  %v1615_v34 = vpop.f32.mrb[3].mxu1  ;;  %v1735_v35 = vand.u32 8388607, %v1728_v27 }
 0x2bf   : > { %v1629_v36 = vshrl.u32 %v1628_v29, 23  ;;  %v1632_v37 = vand.u32 8388607, %v1625_v19  ;;  %v4938_v52 = vadd.f32 %v1615_v34, %v991_v46 }
 0x2c0   : > { %v3740_v38 = vadd.s32 4294967169, %v1732_v32  ;;  %v1937_v40 = vand.u32 2139095040, %v4931_v33  ;;  %v1736_v42 = vor.u32 8388608, %v1735_v35  ;;  %v1934_v56 = vand.u32 2147483647, %v4931_v33 }
 0x2c1   : > { %v3736_v39 = vadd.s32 4294967169, %v1629_v36  ;;  %v1633_v43 = vor.u32 8388608, %v1632_v37 }
 0x2c2   : > { %v1738_v41 = vadd.s32 1, %v3740_v38  ;;  %v1938_v45 = vshrl.u32 %v1937_v40, 23  ;;  %v4940_v53 = vshll.u32 %v1736_v42, 8 }
 0x2c3   : > { %v1635_v44 = vadd.s32 1, %v3736_v39  ;;  %v4944_v55 = vshll.u32 %v1633_v43, 8 }
 0x2c4   : > { %vm1739_vm6 = vcmp.gt.s32.totalorder %v1738_v41, 0  ;;  %v3748_v48 = vadd.s32 4294967169, %v1938_v45 }
 0x2c5   : > { %v1740_v47 = vsel %vm1739_vm6, %v1738_v41, 0  ;;  %vm1636_vm7 = vcmp.gt.s32.totalorder %v1635_v44, 0 }
 0x2c6   : > { %v1741_v49 = vshrl.u32 %v1740_v47, 5  ;;  %v1742_v50 = vand.u32 31, %v1740_v47  ;;  %v1637_v51 = vsel %vm1636_vm7, %v1635_v44, 0  ;;  %v4948_v61 = vadd.s32 1, %v3748_v48 }
 0x2c7   : > { %v4942_v54 = vshrl.u32 %v1637_v51, 5  ;;  %v1639_v60 = vand.u32 31, %v1637_v51 }
 0x2c8   : > { %v1743_v57 = vsub.s32 32, %v1742_v50  ;;  %v1745_v59 = vshll.u32 %v4641_v58, %v1742_v50  ;;  %v1748_v63 = vshll.u32 %v4642_v62, %v1742_v50  ;;  %v1751_v1 = vshll.u32 %v4643_v0, %v1742_v50 }
 0x2c9   : > { %v1754_v3 = vshll.u32 %v4644_v2, %v1742_v50  ;;  %v1757_v5 = vshll.u32 %v4645_v4, %v1742_v50  ;;  %vm1760_vm8 = vcmp.lt.s32.totalorder %v1741_v49, 1  ;;  %vm1761_vm9 = vcmp.lt.s32.totalorder %v1741_v49, 2 }
 0x2ca   : > { %v1746_v9 = vshrl.u32 %v4642_v62, %v1743_v57  ;;  %v1749_v10 = vshrl.u32 %v4643_v0, %v1743_v57  ;;  %v1752_v11 = vshrl.u32 %v4644_v2, %v1743_v57  ;;  %v1744_v12 = vshrl.u32 %v4641_v58, %v1743_v57 }
 0x2cb   : > { %v1755_v13 = vshrl.u32 %v4645_v4, %v1743_v57  ;;  %v1758_v15 = vshrl.u32 %v4646_v14, %v1743_v57  ;;  %v1640_v7 = vsub.s32 32, %v1639_v60  ;;  %vm1762_vm10 = vcmp.lt.s32.totalorder %v1741_v49, 3 }
 0x2cc   : > { %v1747_v16 = vor.u32 %v1746_v9, %v1745_v59  ;;  %v1750_v17 = vor.u32 %v1749_v10, %v1748_v63  ;;  %v1753_v18 = vor.u32 %v1752_v11, %v1751_v1  ;;  %vm1763_vm11 = vcmp.lt.s32.totalorder %v1741_v49, 4 }
 0x2cd   : > { %v1756_v8 = vor.u32 %v1755_v13, %v1754_v3  ;;  %v1759_v21 = vor.u32 %v1758_v15, %v1757_v5  ;;  %v1642_v29 = vshll.u32 %v4641_v58, %v1639_v60  ;;  %v1643_v34 = vshrl.u32 %v4642_v62, %v1640_v7 }
 0x2ce   : > { %v1764_v22 = vsel %vm1760_vm8, %v1744_v12, %v1747_v16  ;;  %v1765_v20 = vsel %vm1763_vm11, %v1753_v18, 2102212464  ;;  %v1768_v6 = vsel %vm1760_vm8, %v1747_v16, %v1750_v17  ;;  %v1772_v23 = vsel %vm1760_vm8, %v1750_v17, %v1753_v18 }
 0x2cf   : > { %v1766_v25 = vsel %vm1762_vm10, %v1750_v17, %v1765_v20  ;;  %v1769_v28 = vsel %vm1763_vm11, %v1756_v8, 920167782  ;;  %v1773_v31 = vsel %vm1763_vm11, %v1759_v21, 1326507024  ;;  %v1645_v35 = vshll.u32 %v4642_v62, %v1639_v60 }
 0x2d0   : > { %v1770_v30 = vsel %vm1762_vm10, %v1753_v18, %v1769_v28  ;;  %v1774_v32 = vsel %vm1762_vm10, %v1756_v8, %v1773_v31  ;;  %v1767_v36 = vsel %vm1761_vm9, %v1764_v22, %v1766_v25  ;;  %v1646_v39 = vshrl.u32 %v4643_v0, %v1640_v7 }
 0x2d1   : > { %v1771_v37 = vsel %vm1761_vm9, %v1768_v6, %v1770_v30  ;;  %v1775_v38 = vsel %vm1761_vm9, %v1772_v23, %v1774_v32  ;;  %v1644_v44 = vor.u32 %v1643_v34, %v1642_v29  ;;  %v1648_v46 = vshll.u32 %v4643_v0, %v1639_v60 }
 0x2d2   : > { %v4971_v40 = vmul.u32.u64.low %v4940_v53, %v1775_v38  ;;  %v4972_v41 = vmul.u32.u64.high %v4940_v53, %v1775_v38, %v4971_v40  ;;  %v4975_v42 = vmul.u32.u64.low %v4940_v53, %v1771_v37  ;;  %v4976_v43 = vmul.u32.u64.high %v4940_v53, %v1771_v37, %v4975_v42 }
 0x2d3   : > { %v1647_v45 = vor.u32 %v1646_v39, %v1645_v35  ;;  %v1649_v47 = vshrl.u32 %v4644_v2, %v1640_v7  ;;  %v1641_v48 = vshrl.u32 %v4641_v58, %v1640_v7  ;;  %v1651_v49 = vshll.u32 %v4644_v2, %v1639_v60 }
 0x2d4   : > { %v1652_v50 = vshrl.u32 %v4645_v4, %v1640_v7  ;;  %v1655_v51 = vshrl.u32 %v4646_v14, %v1640_v7  ;;  %v1783_v57 = vmul.u32 %v4940_v53, %v1767_v36  ;;  %v1654_v63 = vshll.u32 %v4645_v4, %v1639_v60 }
 0x2d5   : > { %v1650_v59 = vor.u32 %v1649_v47, %v1648_v46  ;;  %vm1657_vm12 = vcmp.lt.s32.totalorder %v4942_v54, 1  ;;  %vm1785_vm13 = vc.u32 %v4972_v41, %v4975_v42  ;;  %v1786_v1 = vadd.s32 1, %v4976_v43 }
 0x2d6   : > { %v1653_v3 = vor.u32 %v1652_v50, %v1651_v49  ;;  %vm1658_vm14 = vcmp.lt.s32.totalorder %v4942_v54, 2  ;;  %v1656_v5 = vor.u32 %v1655_v51, %v1654_v63  ;;  %vm1659_vm15 = vcmp.lt.s32.totalorder %v4942_v54, 3 }
 0x2d7   : > { %vm1660_vm0 = vcmp.lt.s32.totalorder %v4942_v54, 4  ;;  %v1665_v9 = vsel %vm1657_vm12, %v1644_v44, %v1647_v45  ;;  %v1787_v53 = vsel %vm1785_vm13, %v1786_v1, %v4976_v43  ;;  %v1669_v60 = vsel %vm1657_vm12, %v1647_v45, %v1650_v59 }
 0x2d8   : > { %v1662_v10 = vsel %vm1660_vm0, %v1650_v59, 2102212464  ;;  %v1666_v11 = vsel %vm1660_vm0, %v1653_v3, 920167782  ;;  %v1788_v12 = vadd.s32 %v1787_v53, %v1783_v57  ;;  %v1661_v13 = vsel %vm1657_vm12, %v1641_v48, %v1644_v44 }
 0x2d9   : > { %v1667_v15 = vsel %vm1659_vm15, %v1650_v59, %v1666_v11  ;;  %v1670_v16 = vsel %vm1660_vm0, %v1656_v5, 1326507024  ;;  %v1663_v17 = vsel %vm1659_vm15, %v1647_v45, %v1662_v10  ;;  %vm1945_vm1 = vcmp.gt.s32.totalorder %v4948_v61, 0 }
 0x2da   : > { %v1668_v18 = vsel %vm1658_vm14, %v1665_v9, %v1667_v15  ;;  %v1671_v7 = vsel %vm1659_vm15, %v1653_v3, %v1670_v16  ;;  %v1789_v8 = vadd.s32 536870912, %v1788_v12  ;;  %v1941_v25 = vand.u32 8388607, %v1934_v56 }
 0x2db   : > { %v1672_v21 = vsel %vm1658_vm14, %v1669_v60, %v1671_v7  ;;  %v4999_v22 = vmul.u32.u64.low %v4944_v55, %v1668_v18  ;;  %v5000_v20 = vmul.u32.u64.high %v4944_v55, %v1668_v18, %v4999_v22  ;;  %v1946_v28 = vsel %vm1945_vm1, %v4948_v61, 0 }
 0x2dc   : > { %v5004_v6 = vmul.u32.u64.low %v4944_v55, %v1672_v21  ;;  %v5005_v23 = vmul.u32.u64.high %v4944_v55, %v1672_v21, %v5004_v6  ;;  %v5010_v31 = vshrl.u32 %v1789_v8, 30  ;;  %v1664_v29 = vsel %vm1658_vm14, %v1661_v13, %v1663_v17 }
 0x2dd   : > { %v1948_v30 = vand.u32 31, %v1946_v28  ;;  %v1683_v34 = vadd.s32 1, %v5000_v20  ;;  %v1834_v36 = vand.u32 2139095040, %v4938_v52  ;;  %v1680_v37 = vmul.u32 %v4944_v55, %v1664_v29 }
 0x2de   : > { %v1791_v32 = vshll.u32 %v5010_v31, 30  ;;  %vm1682_vm2 = vc.u32 %v5005_v23, %v4999_v22  ;;  %v1942_v38 = vor.u32 8388608, %v1941_v25  ;;  %v1831_v44 = vand.u32 2147483647, %v4938_v52 }
 0x2df   : > { %v1949_v35 = vsub.s32 32, %v1948_v30  ;;  %v1684_v39 = vsel %vm1682_vm2, %v1683_v34, %v5000_v20  ;;  %v1835_v45 = vshrl.u32 %v1834_v36, 23  ;;  %v1784_v46 = vadd.s32 %v4975_v42, %v4972_v41 }
 0x2e0   : > { %v1792_v61 = vsub.s32 %v1788_v12, %v1791_v32  ;;  %v1685_v40 = vadd.s32 %v1684_v39, %v1680_v37  ;;  %v5025_v55 = vshll.u32 %v1942_v38, 8  ;;  %v5027_v50 = vshrl.u32 %v1946_v28, 5 }
 0x2e1   : > { %v1952_v43 = vshrl.u32 %v4642_v62, %v1949_v35  ;;  %v1955_v48 = vshrl.u32 %v4643_v0, %v1949_v35  ;;  %v1951_v51 = vshll.u32 %v4641_v58, %v1948_v30  ;;  %v1958_v57 = vshrl.u32 %v4644_v2, %v1949_v35 }
 0x2e2   : > { %v1794_v54 = vsub.s32 0, %v1792_v61  ;;  %v1686_v47 = vadd.s32 536870912, %v1685_v40  ;;  %v1954_v63 = vshll.u32 %v4642_v62, %v1948_v30  ;;  %v1960_v1 = vshll.u32 %v4644_v2, %v1948_v30 }
 0x2e3   : > { %v1961_v41 = vshrl.u32 %v4645_v4, %v1949_v35  ;;  %v1953_v3 = vor.u32 %v1952_v43, %v1951_v51  ;;  %v1957_v5 = vshll.u32 %v4643_v0, %v1948_v30  ;;  %v3744_v9 = vadd.s32 4294967169, %v1835_v45 }
 0x2e4   : > { %v3741_v49 = vmin.u32 %v1794_v54, %v1792_v61  ;;  %v5031_v59 = vshrl.u32 %v1686_v47, 30  ;;  %v1956_v10 = vor.u32 %v1955_v48, %v1954_v63  ;;  %v1964_v60 = vshrl.u32 %v4646_v14, %v1949_v35 }
 0x2e5   : > { %v1962_v11 = vor.u32 %v1961_v41, %v1960_v1  ;;  %v1814_v13 = vsub.s32 4, %v5010_v31  ;;  %v1959_v15 = vor.u32 %v1958_v57, %v1957_v5  ;;  %v5042_v16 = vand.u32 8388607, %v1831_v44 }
 0x2e6   : > { %v1796_v42 = vclz %v3741_v49  ;;  %v1688_v53 = vshll.u32 %v5031_v59, 30  ;;  %v1950_v18 = vshrl.u32 %v4641_v58, %v1949_v35  ;;  %v1963_v7 = vshll.u32 %v4645_v4, %v1948_v30 }
 0x2e7   : > { %vm1969_vm4 = vcmp.lt.s32.totalorder %v5027_v50, 4  ;;  %vm1966_vm7 = vcmp.lt.s32.totalorder %v5027_v50, 1  ;;  %vm1968_vm8 = vcmp.lt.s32.totalorder %v5027_v50, 3  ;;  %vm5059_vm9 = vcmp.le.f32.partialorder %v1728_v27, 0.7853982 }
 0x2e8   : > { %v3742_v12 = vadd.s32 4294967294, %v1796_v42  ;;  %v5045_v17 = vsub.s32 %v1685_v40, %v1688_v53  ;;  %v1975_v8 = vsel %vm1969_vm4, %v1962_v11, 920167782  ;;  %v1965_v6 = vor.u32 %v1964_v60, %v1963_v7 }
 0x2e9   : > { %v1974_v25 = vsel %vm1966_vm7, %v1953_v3, %v1956_v10  ;;  %vm1967_vm10 = vcmp.lt.s32.totalorder %v5027_v50, 2  ;;  %v1976_v32 = vsel %vm1968_vm8, %v1959_v15, %v1975_v8  ;;  %v1970_v36 = vsel %vm1966_vm7, %v1950_v18, %v1953_v3 }
 0x2ea   : > { %vm3743_vm6 = vcmp.lt.s32.totalorder %v3742_v12, 0  ;;  %v1691_v20 = vsub.s32 0, %v5045_v17  ;;  %v1971_v37 = vsel %vm1969_vm4, %v1959_v15, 2102212464  ;;  %v1977_v39 = vsel %vm1967_vm10, %v1974_v25, %v1976_v32 }
 0x2eb   : > { %v1799_v21 = vsel %vm3743_vm6, 0, %v3742_v12  ;;  %v1978_v40 = vsel %vm1966_vm7, %v1956_v10, %v1959_v15  ;;  %v1979_v43 = vsel %vm1969_vm4, %v1965_v6, 1326507024  ;;  %v1972_v49 = vsel %vm1968_vm8, %v1956_v10, %v1971_v37 }
 0x2ec   : > { %v1800_v29 = vsub.s32 32, %v1799_v21  ;;  %v1804_v30 = vsub.s32 4294967266, %v1799_v21  ;;  %v1801_v34 = vshll.u32 %v1792_v61, %v1799_v21  ;;  %v3737_v35 = vmin.u32 %v1691_v20, %v5045_v17  ;;  %v3752_v61 = vld [vmem:[%s5781_s4 + $0x20] sm:$0xff] }
 0x2ed   : > { %v5081_v45 = vmul.u32.u64.low %v5025_v55, %v1977_v39  ;;  %v5082_v47 = vmul.u32.u64.high %v5025_v55, %v1977_v39, %v5081_v45  ;;  %v1980_v51 = vsel %vm1968_vm8, %v1962_v11, %v1979_v43  ;;  %v1841_v1 = vadd.s32 1, %v3744_v9 }
 0x2ee   : > { %v1802_v27 = vshrl.u32 %v1784_v46, %v1800_v29  ;;  %v1805_v38 = vadd.s32 127, %v1804_v30  ;;  %v1693_v54 = vclz %v3737_v35  ;;  %v1981_v63 = vsel %vm1967_vm10, %v1978_v40, %v1980_v51 }
 0x2ef   : > { %v5092_v41 = vsel %vm998_vm5, %v3752_v61, 0  ;;  %v1815_v3 = vsel %vm1730_vm3, %v1814_v13, %v5010_v31  ;;  %v5098_v5 = vmul.u32.u64.low %v5025_v55, %v1981_v63  ;;  %v5099_v53 = vmul.u32.u64.high %v5025_v55, %v1981_v63, %v5098_v5 }
 0x2f0   : > { %v1803_v46 = vor.u32 %v1802_v27, %v1801_v34  ;;  %v1806_v48 = vshll.u32 %v1805_v38, 23  ;;  %v3738_v57 = vadd.s32 4294967294, %v1693_v54  ;;  %v1973_v10 = vsel %vm1967_vm10, %v1970_v36, %v1972_v49 }
 0x2f1   : > { %v1992_v11 = vadd.s32 1, %v5082_v47  ;;  %vm1842_vm12 = vcmp.gt.s32.totalorder %v1841_v1, 0  ;;  %v1817_v18 = vsel %vm5059_vm9, 0, %v1815_v3  ;;  %v1681_v31 = vadd.s32 %v4999_v22, %v5005_v23 }
 0x2f2   : > { %v1807_v42 = vor.u32 4788187, %v1806_v48  ;;  %vm3739_vm11 = vcmp.lt.s32.totalorder %v3738_v57, 0  ;;  %v1810_v60 = vcvt.s32.f32 %v1803_v46  ;;  %v1843_v15 = vsel %vm1842_vm12, %v1841_v1, 0 }
 0x2f3   : > { %v1696_v12 = vsel %vm3739_vm11, 0, %v3738_v57  ;;  %v1989_v21 = vmul.u32 %v5025_v55, %v1973_v10  ;;  %vm1991_vm13 = vc.u32 %v5099_v53, %v5081_v45  ;;  %v1845_v50 = vand.u32 31, %v1843_v15 }
 0x2f4   : > { %v1808_v9 = vand.u32 2147483647, %v1807_v42  ;;  %v1697_v13 = vsub.s32 32, %v1696_v12  ;;  %v1701_v7 = vsub.s32 4294967266, %v1696_v12  ;;  %vm1627_vm14 = vcmp.lt.s32.totalorder %v4925_v26, 0 }
 0x2f5   : > { %v1698_v20 = vshll.u32 %v5045_v17, %v1696_v12  ;;  %v1993_v29 = vsel %vm1991_vm13, %v1992_v11, %v5082_v47  ;;  %v5114_v32 = vand.u32 3, %v1817_v18  ;;  %v1846_v23 = vsub.s32 32, %v1845_v50 }
 0x2f6   : > { %v1811_v8 = vmul.f32 %v1810_v60, %v1808_v9  ;;  %v1699_v6 = vshrl.u32 %v1681_v31, %v1697_v13  ;;  %v1702_v25 = vadd.s32 127, %v1701_v7  ;;  %v1994_v22 = vadd.s32 %v1993_v29, %v1989_v21 }
 0x2f7   : > { %v1711_v55 = vsub.s32 4, %v5031_v59  ;;  %v1839_v36 = vor.u32 8388608, %v5042_v16  ;;  %v5120_v17 = vshrl.u32 %v1843_v15, 5  ;;  %v1848_v38 = vshll.u32 %v4641_v58, %v1845_v50 }
 0x2f8   : > { %v1812_v30 = vxor.u32 2147483648, %v1811_v8  ;;  %v1700_v34 = vor.u32 %v1699_v6, %v1698_v20  ;;  %v1703_v35 = vshll.u32 %v1702_v25, 23  ;;  %v1995_v27 = vadd.s32 536870912, %v1994_v22 }
 0x2f9   : > { %vm5128_vm15 = vcmp.le.f32.partialorder %v1625_v19, 0.7853982  ;;  %v1849_v16 = vshrl.u32 %v4642_v62, %v1846_v23  ;;  %v1852_v54 = vshrl.u32 %v4643_v0, %v1846_v23  ;;  %v1854_v47 = vshll.u32 %v4643_v0, %v1845_v50 }
 0x2fa   : > { %v1813_v37 = vsel %vm1730_vm3, %v1812_v30, %v1811_v8  ;;  %v1704_v61 = vor.u32 4788187, %v1703_v35  ;;  %v5134_v43 = vshrl.u32 %v1995_v27, 30  ;;  %v1855_v46 = vshrl.u32 %v4644_v2, %v1846_v23 }
 0x2fb   : > { %v1816_v39 = vsel %vm5059_vm9, %v4923_v24, %v1813_v37  ;;  %v1707_v48 = vcvt.s32.f32 %v1700_v34  ;;  %v1851_v19 = vshll.u32 %v4642_v62, %v1845_v50  ;;  %v1857_v57 = vshll.u32 %v4644_v2, %v1845_v50 }
 0x2fc   : > { %4542 = vcosq.f32 %v1816_v39  ;;  %v1705_v28 = vand.u32 2147483647, %v1704_v61  ;;  %v1997_v49 = vshll.u32 %v5134_v43, 30  ;;  %v1856_v51 = vor.u32 %v1855_v46, %v1854_v47 }
 0x2fd   : > { %4544 = vsinq.f32 %v1816_v39  ;;  %v1858_v63 = vshrl.u32 %v4645_v4, %v1846_v23  ;;  %v1850_v42 = vor.u32 %v1849_v16, %v1848_v38  ;;  %v1853_v3 = vor.u32 %v1852_v54, %v1851_v19 }
 0x2fe   : > { %v1708_v1 = vmul.f32 %v1707_v48, %v1705_v28  ;;  %v1861_v5 = vshrl.u32 %v4646_v14, %v1846_v23  ;;  %vm1826_vm0 = vcmp.eq.s32.totalorder %v5114_v32, 2  ;;  %v1712_v10 = vsel %vm1627_vm14, %v1711_v55, %v5031_v59 }
 0x2ff   : > { %v5147_v11 = vsub.s32 %v1994_v22, %v1997_v49  ;;  %v1859_v9 = vor.u32 %v1858_v63, %v1857_v57  ;;  %v5149_v60 = vshll.u32 %v1839_v36, 8  ;;  %vm1823_vm1 = vcmp.eq.s32.totalorder %v5114_v32, 0 }
 0x300   : > { %v1709_v12 = vxor.u32 2147483648, %v1708_v1  ;;  %v1860_v15 = vshll.u32 %v4645_v4, %v1845_v50  ;;  %vm1866_vm2 = vcmp.lt.s32.totalorder %v5120_v17, 4  ;;  %v5155_v18 = vand.u32 4294901760, %v5092_v41 }
 0x301   : > { %vm1822_vm3 = vcmp.lt.s32.totalorder %v5114_v32, 2  ;;  %v2000_v31 = vsub.s32 0, %v5147_v11  ;;  %v1847_v59 = vshrl.u32 %v4641_v58, %v1846_v23  ;;  %vm1863_vm4 = vcmp.lt.s32.totalorder %v5120_v17, 1 }
 0x302   : > { %v1868_v13 = vsel %vm1866_vm2, %v1856_v51, 2102212464  ;;  %vm1820_vm6 = vweird.f32 %v4923_v24  ;;  %v1710_v7 = vsel %vm1627_vm14, %v1709_v12, %v1708_v1  ;;  %v1862_v8 = vor.u32 %v1861_v5, %v1860_v15 }
 0x303   : > { %v1871_v21 = vsel %vm1863_vm4, %v1850_v42, %v1853_v3  ;;  %v1872_v50 = vsel %vm1866_vm2, %v1859_v9, 920167782  ;;  %v1713_v20 = vsel %vm5128_vm15, %v4925_v26, %v1710_v7  ;;  %v3749_v6 = vmin.u32 %v2000_v31, %v5147_v11 }
 0x304   : > { %vm1864_vm7 = vcmp.lt.s32.totalorder %v5120_v17, 2  ;;  %vm1865_vm8 = vcmp.lt.s32.totalorder %v5120_v17, 3  ;;  %4546 = vcosq.f32 %v1713_v20  ;;  %v1867_v25 = vsel %vm1863_vm4, %v1847_v59, %v1850_v42 }
 0x305   : > { %v1869_v29 = vsel %vm1865_vm8, %v1853_v3, %v1868_v13  ;;  %v1873_v30 = vsel %vm1865_vm8, %v1856_v51, %v1872_v50  ;;  %4548 = vsinq.f32 %v1713_v20  ;;  %v2002_v23 = vclz %v3749_v6 }
 0x306   : > { %v4543_v22 = vpop.eup %4542  ;;  %v1874_v34 = vsel %vm1864_vm7, %v1871_v21, %v1873_v30  ;;  %v1875_v35 = vsel %vm1863_vm4, %v1853_v3, %v1856_v51  ;;  %v1876_v37 = vsel %vm1866_vm2, %v1862_v8, 1326507024  ;;  %v1714_v61 = vsel %vm5128_vm15, 0, %v1712_v10 }
 0x307   : > { %v4545_v55 = vpop.eup %4544  ;;  %v1827_v36 = vxor.u32 2147483648, %v4543_v22  ;;  %v5189_v27 = vmul.u32.u64.low %v5149_v60, %v1874_v34  ;;  %v5190_v38 = vmul.u32.u64.high %v5149_v60, %v1874_v34, %v5189_v27  ;;  %v3750_v16 = vadd.s32 4294967294, %v2002_v23 }
 0x308   : > { %v1824_v39 = vxor.u32 2147483648, %v4545_v55  ;;  %v1877_v54 = vsel %vm1865_vm8, %v1859_v9, %v1876_v37  ;;  %v1870_v46 = vsel %vm1864_vm7, %v1867_v25, %v1869_v29  ;;  %v5205_v48 = vsub.f32 %v5092_v41, %v5155_v18 }
 0x309   : > { %v1828_v47 = vsel %vm1826_vm0, %v1827_v36, %v4545_v55  ;;  %v1878_v28 = vsel %vm1864_vm7, %v1875_v35, %v1877_v54  ;;  %vm3751_vm9 = vcmp.lt.s32.totalorder %v3750_v16, 0  ;;  %v1889_v63 = vadd.s32 1, %v5190_v38 }
 0x30a   : > { %v1825_v40 = vsel %vm1823_vm1, %v4543_v22, %v1824_v39  ;;  %v5210_v19 = vmul.u32.u64.low %v5149_v60, %v1878_v28  ;;  %v5211_v49 = vmul.u32.u64.high %v5149_v60, %v1878_v28, %v5210_v19  ;;  %v2005_v57 = vsel %vm3751_vm9, 0, %v3750_v16 }
 0x30b   : > { %v1829_v51 = vsel %vm1822_vm3, %v1825_v40, %v1828_v47  ;;  %v2150_v17 = vand.u32 4294901760, %v5205_v48  ;;  %v1990_v1 = vadd.s32 %v5081_v45, %v5099_v53  ;;  %v2006_v42 = vsub.s32 32, %v2005_v57 }
 0x30c   : > { %v5219_v41 = vsel %vm1820_vm6, nan, %v1829_v51  ;;  %v2010_v3 = vsub.s32 4294967266, %v2005_v57  ;;  %v1718_v5 = vand.u32 3, %v1714_v61  ;;  %v1886_v10 = vmul.u32 %v5149_v60, %v1870_v46 }
 0x30d   : > { %v2151_v32 = vsub.f32 %v5205_v48, %v2150_v17  ;;  %v2007_v9 = vshll.u32 %v5147_v11, %v2005_v57  ;;  %v2008_v12 = vshrl.u32 %v1990_v1, %v2006_v42  ;;  %vm1888_vm10 = vc.u32 %v5211_v49, %v5189_v27 }
 0x30e   : > { %v2011_v15 = vadd.s32 127, %v2010_v3  ;;  %v4547_v24 = vpop.eup %4546  ;;  %v1890_v31 = vsel %vm1888_vm10, %v1889_v63, %v5190_v38  ;;  %vm1723_vm11 = vcmp.eq.s32.totalorder %v1718_v5, 2  ;;  %vm1720_vm12 = vcmp.eq.s32.totalorder %v1718_v5, 0 }
 0x30f   : > { %v2152_v45 = vand.u32 4294901760, %v2151_v32  ;;  %v4549_v53 = vpop.eup %4548  ;;  %v1724_v59 = vxor.u32 2147483648, %v4547_v24  ;;  %v2009_v13 = vor.u32 %v2008_v12, %v2007_v9  ;;  %v1891_v60 = vadd.s32 %v1890_v31, %v1886_v10 }
 0x310   : > { %v2012_v7 = vshll.u32 %v2011_v15, 23  ;;  %v1721_v8 = vxor.u32 2147483648, %v4549_v53  ;;  %v2083_v20 = vand.u32 4294901760, %v5219_v41  ;;  %vm1717_vm13 = vweird.f32 %v4925_v26 }
 0x311   : > { %4082 = vmatprep.mubr.f32.mxu0 %v2152_v45  ;;  %v1725_v21 = vsel %vm1723_vm11, %v1724_v59, %v4549_v53  ;;  %v1892_v50 = vadd.s32 536870912, %v1891_v60  ;;  %vm1719_vm14 = vcmp.lt.s32.totalorder %v1718_v5, 2  ;;  %v2016_v30 = vcvt.s32.f32 %v2009_v13 }
 0x312   : > { %v2013_v11 = vor.u32 4788187, %v2012_v7  ;;  %v1722_v6 = vsel %vm1720_vm12, %v4547_v24, %v1721_v8  ;;  %vm1936_vm15 = vcmp.lt.s32.totalorder %v4931_v33, 0  ;;  %vm5244_vm0 = vcmp.le.f32.partialorder %v1934_v56, 0.7853982 }
 0x313   : > { %v1726_v25 = vsel %vm1719_vm14, %v1722_v6, %v1725_v21  ;;  %v1893_v22 = vshrl.u32 %v1892_v50, 30  ;;  %v2020_v28 = vsub.s32 4, %v5134_v43  ;;  %v1887_v19 = vadd.s32 %v5189_v27, %v5211_v49  ;;  %v3753_v21 = vld [vmem:[%s5781_s4 + $0x28] sm:$0xff] }
 0x314   : > { %v2014_v29 = vand.u32 2147483647, %v2013_v11  ;;  %v1727_v23 = vsel %vm1717_vm13, nan, %v1726_v25  ;;  %vm5261_vm4 = vcmp.le.f32.partialorder %v1831_v44, 0.7853982  ;;  %vm1833_vm6 = vcmp.lt.s32.totalorder %v4938_v52, 0 }
 0x315   : > { %v2080_v34 = vand.u32 4294901760, %v1727_v23  ;;  %v1894_v55 = vshll.u32 %v1893_v22, 30  ;;  %v2021_v42 = vsel %vm1936_vm15, %v2020_v28, %v5134_v43  ;;  %v3754_v44 = vld [vmem:[%s5781_s4 + $0x30] sm:$0xff]  ;;  %v2071_v6 = vsel %vm998_vm5, %v3753_v21, 0 }
 0x316   : > { %v2017_v35 = vmul.f32 %v2016_v30, %v2014_v29  ;;  %v2023_v32 = vsel %vm5244_vm0, 0, %v2021_v42  ;;  %vm2026_vm8 = vweird.f32 %v4931_v33  ;;  %v5282_v29 = vsub.f32 %v5219_v41, %v2083_v20 }
 0x317   : > { %v5235_v36 = vpack.c.bf16 %v2083_v20, %v2080_v34  ;;  %v1895_v38 = vsub.s32 %v1891_v60, %v1894_v55  ;;  %v2027_v27 = vand.u32 3, %v2023_v32  ;;  %v1917_v60 = vsub.s32 4, %v1893_v22 }
 0x318   : > { %v2018_v37 = vxor.u32 2147483648, %v2017_v35  ;;  %v5277_v25 = vsub.f32 %v1727_v23, %v2080_v34  ;;  %v2074_v30 = vsel %vm998_vm5, %v3754_v44, 0  ;;  %v2198_v20 = vand.u32 4294901760, %v5282_v29 }
 0x319   : > { %v1897_v39 = vsub.s32 0, %v1895_v38  ;;  %4273 = vmatprep.subr.bf16.mxu0 %v5235_v36  ;;  %vm2029_vm2 = vcmp.eq.s32.totalorder %v2027_v27, 0  ;;  %vm2032_vm3 = vcmp.eq.s32.totalorder %v2027_v27, 2  ;;  %vm2028_vm7 = vcmp.lt.s32.totalorder %v2027_v27, 2 }
 0x31a   : > { %v2019_v26 = vsel %vm1936_vm15, %v2018_v37, %v2017_v35  ;;  %4275 = vmatpush3.bf16.msra.mxu0 %v5235_v36  ;;  %v1918_v50 = vsel %vm1833_vm6, %v1917_v60, %v1893_v22  ;;  %v3755_v35 = vld [vmem:[%s5781_s4 + $0x38] sm:$0xff]  ;;  %v5290_v37 = vand.u32 4294901760, %v2071_v6  ;;  %v2191_v41 = vand.u32 4294901760, %v5277_v25 }
 0x31b   : > { %v3745_v16 = vmin.u32 %v1897_v39, %v1895_v38  ;;  %v2022_v54 = vsel %vm5244_vm0, %v4931_v33, %v2019_v26  ;;  %v1920_v22 = vsel %vm5261_vm4, 0, %v1918_v50  ;;  %v5292_v33 = vand.u32 4294901760, %v2074_v30 }
 0x31c   : > { %4550 = vcosq.f32 %v2022_v54  ;;  %v2077_v23 = vsel %vm998_vm5, %v3755_v35, 0  ;;  %v5298_v26 = vsub.f32 %v2071_v6, %v5290_v37  ;;  %v2199_v28 = vsub.f32 %v5282_v29, %v2198_v20 }
 0x31d   : > { %v1899_v47 = vclz %v3745_v16  ;;  %4552 = vsinq.f32 %v2022_v54  ;;  %v5300_v39 = vand.u32 4294901760, %v2077_v23  ;;  %v5303_v16 = vsub.f32 %v2074_v30, %v5292_v33 }
 0x31e   : > { %vm1923_vm11 = vweird.f32 %v4938_v52  ;;  %v4288_v44 = vpack.c.bf16 %v5282_v29, %v5277_v25  ;;  %v4304_v50 = vpack.c.bf16 %v2198_v20, %v2191_v41 }
 0x31f   : > { %v3746_v46 = vadd.s32 4294967294, %v1899_v47 }
 0x321   : > { %vm3747_vm1 = vcmp.lt.s32.totalorder %v3746_v46, 0 }
 0x322   : > { %v1902_v40 = vsel %vm3747_vm1, 0, %v3746_v46  ;;  %v2192_v46 = vsub.f32 %v5277_v25, %v2191_v41  ;;  %v2050_v25 = vpop.permute.xlu1 %2049 }
 0x323   : > { %v1903_v56 = vsub.s32 32, %v1902_v40  ;;  %v1907_v51 = vsub.s32 4294967266, %v1902_v40  ;;  %v1904_v57 = vshll.u32 %v1895_v38, %v1902_v40  ;;  %v1924_v38 = vand.u32 3, %v1920_v22 }
 0x325   : > { %v1905_v63 = vshrl.u32 %v1887_v19, %v1903_v56  ;;  %v1908_v1 = vadd.s32 127, %v1907_v51  ;;  %vm1929_vm9 = vcmp.eq.s32.totalorder %v1924_v38, 2  ;;  %vm1926_vm10 = vcmp.eq.s32.totalorder %v1924_v38, 0 }
 0x326   : > { %v4551_v10 = vpop.eup %4550  ;;  %v2160_v51 = vand.u32 4294901760, %v5298_v26  ;;  %vm1925_vm12 = vcmp.lt.s32.totalorder %v1924_v38, 2 }
 0x327   : > { %v1906_v3 = vor.u32 %v1905_v63, %v1904_v57  ;;  %v1909_v5 = vshll.u32 %v1908_v1, 23  ;;  %v4553_v12 = vpop.eup %4552  ;;  %v2033_v31 = vxor.u32 2147483648, %v4551_v10  ;;  %v2179_v57 = vsub.f32 %v2077_v23, %v5300_v39 }
 0x328   : > { %v2030_v49 = vxor.u32 2147483648, %v4553_v12  ;;  %v2170_v1 = vand.u32 4294901760, %v5303_v16 }
 0x329   : > { %v1910_v9 = vor.u32 4788187, %v1909_v5  ;;  %v1913_v24 = vcvt.s32.f32 %v1906_v3  ;;  %v2034_v13 = vsel %vm2032_vm3, %v2033_v31, %v4553_v12  ;;  %v2193_v3 = vand.u32 4294901760, %v2192_v46 }
 0x32a   : > { %v2031_v59 = vsel %vm2029_vm2, %v4551_v10, %v2030_v49  ;;  %v2200_v5 = vand.u32 4294901760, %v2199_v28  ;;  %v2161_v12 = vsub.f32 %v5298_v26, %v2160_v51 }
 0x32b   : > { %v1911_v15 = vand.u32 2147483647, %v1910_v9  ;;  %v2035_v11 = vsel %vm2028_vm7, %v2031_v59, %v2034_v13 }
 0x32c   : > { %v2036_v55 = vsel %vm2026_vm8, nan, %v2035_v11  ;;  %v4280_v49 = vpack.c.bf16 %v2200_v5, %v2193_v3 }
 0x32d   : > { %v1914_v45 = vmul.f32 %v1913_v24, %v1911_v15  ;;  %v2089_v34 = vand.u32 4294901760, %v2036_v55  ;;  %v2180_v15 = vand.u32 4294901760, %v2179_v57  ;;  %v2171_v24 = vsub.f32 %v5303_v16, %v2170_v1 }
 0x32f   : > { %v1915_v53 = vxor.u32 2147483648, %v1914_v45  ;;  %v5311_v40 = vsub.f32 %v2036_v55, %v2089_v34  ;;  %v2172_v59 = vand.u32 4294901760, %v2171_v24 }
 0x331   : > { %v1916_v7 = vsel %vm1833_vm6, %v1915_v53, %v1914_v45  ;;  %v2212_v10 = vand.u32 4294901760, %v5311_v40  ;;  %v2162_v45 = vand.u32 4294901760, %v2161_v12  ;;  %v2181_v53 = vsub.f32 %v2179_v57, %v2180_v15 }
 0x332   : > { %v1919_v8 = vsel %vm5261_vm4, %v4938_v52, %v1916_v7 }
 0x333   : > { %4554 = vcosq.f32 %v1919_v8  ;;  %v2213_v52 = vsub.f32 %v5311_v40, %v2212_v10  ;;  %v2182_v60 = vand.u32 4294901760, %v2181_v53 }
 0x334   : > { %4556 = vsinq.f32 %v1919_v8 }
 0x335   : > { %v2214_v7 = vand.u32 4294901760, %v2213_v52 }
 0x33d   : > { %v4555_v61 = vpop.eup %4554 }
 0x33e   : > { %v4557_v54 = vpop.eup %4556  ;;  %v1930_v47 = vxor.u32 2147483648, %v4555_v61 }
 0x33f   : > { %v1927_v19 = vxor.u32 2147483648, %v4557_v54 }
 0x340   : > { %v1931_v56 = vsel %vm1929_vm9, %v1930_v47, %v4557_v54 }
 0x341   : > { %v1928_v63 = vsel %vm1926_vm10, %v4555_v61, %v1927_v19  ;;  %v2060_v19 = vpop.permute.xlu1 %2059 }
 0x342   : > { %v1932_v42 = vsel %vm1925_vm12, %v1928_v63, %v1931_v56 }
 0x343   : > { %v1933_v32 = vsel %vm1923_vm11, nan, %v1932_v42 }
 0x344   : > { %v2086_v9 = vand.u32 4294901760, %v1933_v32 }
 0x346   : > { %v4276_v27 = vpack.c.bf16 %v2089_v34, %v2086_v9  ;;  %v2204_v31 = vsub.f32 %v1933_v32, %v2086_v9 }
 0x348   : > { %4277 = vmatprep.subr.bf16.mxu0 %v4276_v27  ;;  %v2205_v43 = vand.u32 4294901760, %v2204_v31  ;;  %v4292_v11 = vpack.c.bf16 %v5311_v40, %v2204_v31 }
 0x349   : > { %4279 = vmatpush3.bf16.msra.mxu0 %v4276_v27 }
 0x34a   : > { %4281 = vmatprep.subr.bf16.mxu0 %v4280_v49  ;;  %v2206_v13 = vsub.f32 %v2204_v31, %v2205_v43  ;;  %v4308_v6 = vpack.c.bf16 %v2212_v10, %v2205_v43 }
 0x34c   : > { %4083 = vmatmul.mubr.f32.vlgmr.msra.gmra.mrb[4].mxu0 %v2162_v45  ;;  %v2207_v8 = vand.u32 4294901760, %v2206_v13 }
 0x34d   : > { %4283 = vmatpush3.bf16.msra.mxu0 %v4280_v49  ;;  %4085 = vmatprep.mubr.f32.mxu0 %v2172_v59 }
 0x34e   : > { %v4284_v21 = vpack.c.bf16 %v2214_v7, %v2207_v8 }
 0x350   : > { %4086 = vmatmul.mubr.f32.gmra.mrb[6].mxu0 %v2182_v60  ;;  %4285 = vmatprep.subr.bf16.mxu0 %v4284_v21 }
 0x351   : > { %4287 = vmatpush3.bf16.msra.mxu0 %v4284_v21  ;;  %4096 = vmatprep.mubr.f32.mxu0 %v5155_v18 }
 0x352   : > { %4289 = vmatprep.subr.bf16.mxu0 %v4288_v44 }
 0x354   : > { %4097 = vmatmul.mubr.f32.vlgmr.msra.gmra.mrb[4].mxu0 %v5290_v37 }
 0x355   : > { %4291 = vmatpush3.bf16.msra.mxu0 %v4288_v44  ;;  %4099 = vmatprep.mubr.f32.mxu0 %v5292_v33 }
 0x356   : > { %4293 = vmatprep.subr.bf16.mxu0 %v4292_v11 }
 0x358   : > { %4100 = vmatmul.mubr.f32.gmra.mrb[6].mxu0 %v5300_v39 }
 0x359   : > { %4295 = vmatpush3.bf16.msra.mxu0 %v4292_v11  ;;  %4110 = vmatprep.mubr.f32.mxu0 %v5205_v48  ;;  %v2055_v48 = vpop.permute.xlu0 %2054 }
 0x35a   : > { %4297 = vmatprep.subr.bf16.mxu0 %v5235_v36 }
 0x35c   : > { %4111 = vmatmul.mubr.f32.vlgmr.msra.gmra.mrb[4].mxu0 %v5298_v26 }
 0x35d   : > { %4299 = vmatpush3.bf16.msra.mxu0 %v5235_v36  ;;  %4113 = vmatprep.mubr.f32.mxu0 %v5303_v16  ;;  %v2065_v22 = vpop.permute.xlu0 %2064 }
 0x35e   : > { %4301 = vmatprep.subr.bf16.mxu0 %v4276_v27 }
 0x360   : > { %4114 = vmatmul.mubr.f32.gmra.mrb[6].mxu0 %v2179_v57 }
 0x361   : > { %4303 = vmatpush3.bf16.msra.mxu0 %v4276_v27  ;;  %4124 = vmatprep.mubr.f32.mxu0 %v2150_v17 }
 0x362   : > { %4305 = vmatprep.subr.bf16.mxu0 %v4304_v50 }
 0x364   : > { %4125 = vmatmul.mubr.f32.vlgmr.msra.gmra.mrb[4].mxu0 %v2160_v51 }
 0x365   : > { %4307 = vmatpush3.bf16.msra.mxu0 %v4304_v50  ;;  %4127 = vmatprep.mubr.f32.mxu0 %v2170_v1 }
 0x366   : > { %4309 = vmatprep.subr.bf16.mxu0 %v4308_v6 }
 0x368   : > { %4128 = vmatmul.mubr.f32.gmra.mrb[6].mxu0 %v2180_v15 }
 0x369   : > { %4311 = vmatpush3.bf16.msra.mxu0 %v4308_v6  ;;  %4138 = vmatprep.mubr.f32.mxu0 %v5155_v18 }
 0x36a   : > { %4313 = vmatprep.subr.bf16.mxu0 %v5235_v36 }
 0x36c   : > { %4139 = vmatmul.mubr.f32.vlgmr.msra.gmra.mrb[4].mxu0 %v5290_v37 }
 0x36d   : > { %4315 = vmatpush3.bf16.msra.mxu0 %v5235_v36  ;;  %4141 = vmatprep.mubr.f32.mxu0 %v5292_v33 }
 0x36e   : > { %4317 = vmatprep.subr.bf16.mxu0 %v4276_v27 }
 0x370   : > { %4142 = vmatmul.mubr.f32.gmra.mrb[6].mxu0 %v5300_v39 }
 0x371   : > { %4319 = vmatpush3.bf16.msra.mxu0 %v4276_v27  ;;  %4152 = vmatprep.mubr.f32.mxu0 %v5155_v18 }
 0x374   : > { %4153 = vmatmul.mubr.f32.vlgmr.msra.gmra.mrb[4].mxu0 %v5290_v37 }
 0x375   : > { %4155 = vmatprep.mubr.f32.mxu0 %v5292_v33 }
 0x378   : > { %4156 = vmatmul.mubr.f32.gmra.mrb[6].mxu0 %v5300_v39 }
 0x447   : > { %v4154_v17 = vpop.f32.mrb[4].mxu0 }
 0x448   : > { %v5349_v29 = vadd.f32 %v4154_v17, %v2055_v48  ;;  %v2671_v36 = vpop.f32.mrb[5].mxu0 }
 0x449   : > { %v5351_v30 = vadd.f32 %v2671_v36, %v2050_v25 }
 0x44a   : > { %v2796_v35 = vand.u32 2147483647, %v5349_v29  ;;  %v2799_v55 = vand.u32 2139095040, %v5349_v29  ;;  %vm2798_vm11 = vcmp.lt.s32.totalorder %v5349_v29, 0 }
 0x44b   : > { %v2693_v18 = vand.u32 2147483647, %v5351_v30  ;;  %v2696_v37 = vand.u32 2139095040, %v5351_v30  ;;  %v4157_v33 = vpop.f32.mrb[6].mxu0 }
 0x44c   : > { %v2800_v23 = vshrl.u32 %v2799_v55, 23  ;;  %v5357_v34 = vadd.f32 %v4157_v33, %v2065_v22  ;;  %v2683_v41 = vpop.f32.mrb[7].mxu0  ;;  %v2803_v20 = vand.u32 8388607, %v2796_v35 }
 0x44d   : > { %v2697_v38 = vshrl.u32 %v2696_v37, 23  ;;  %v2700_v26 = vand.u32 8388607, %v2693_v18  ;;  %v5364_v42 = vadd.f32 %v2683_v41, %v2060_v19 }
 0x44e   : > { %v3764_v39 = vadd.s32 4294967169, %v2800_v23  ;;  %v3005_v16 = vand.u32 2139095040, %v5357_v34  ;;  %v2804_v47 = vor.u32 8388608, %v2803_v20  ;;  %v3002_v32 = vand.u32 2147483647, %v5357_v34 }
 0x44f   : > { %v3760_v61 = vadd.s32 4294967169, %v2697_v38  ;;  %v2701_v46 = vor.u32 8388608, %v2700_v26 }
 0x450   : > { %v2806_v54 = vadd.s32 1, %v3764_v39  ;;  %v3006_v40 = vshrl.u32 %v3005_v16, 23  ;;  %v5366_v3 = vshll.u32 %v2804_v47, 8 }
 0x451   : > { %v2703_v28 = vadd.s32 1, %v3760_v61  ;;  %v5370_v10 = vshll.u32 %v2701_v46, 8 }
 0x452   : > { %vm2807_vm13 = vcmp.gt.s32.totalorder %v2806_v54, 0  ;;  %v3772_v51 = vadd.s32 4294967169, %v3006_v40 }
 0x453   : > { %v2808_v56 = vsel %vm2807_vm13, %v2806_v54, 0  ;;  %vm2704_vm14 = vcmp.gt.s32.totalorder %v2703_v28, 0 }
 0x454   : > { %v2809_v57 = vshrl.u32 %v2808_v56, 5  ;;  %v2810_v63 = vand.u32 31, %v2808_v56  ;;  %v2705_v1 = vsel %vm2704_vm14, %v2703_v28, 0  ;;  %v5374_v24 = vadd.s32 1, %v3772_v51 }
 0x455   : > { %v5368_v5 = vshrl.u32 %v2705_v1, 5  ;;  %v2707_v15 = vand.u32 31, %v2705_v1 }
 0x456   : > { %v2811_v9 = vsub.s32 32, %v2810_v63  ;;  %v2813_v12 = vshll.u32 %v4641_v58, %v2810_v63  ;;  %v2816_v27 = vshll.u32 %v4642_v62, %v2810_v63  ;;  %v2819_v49 = vshll.u32 %v4643_v0, %v2810_v63 }
 0x457   : > { %v2822_v31 = vshll.u32 %v4644_v2, %v2810_v63  ;;  %v2825_v52 = vshll.u32 %v4645_v4, %v2810_v63  ;;  %vm2828_vm15 = vcmp.lt.s32.totalorder %v2809_v57, 1  ;;  %vm2829_vm0 = vcmp.lt.s32.totalorder %v2809_v57, 2 }
 0x458   : > { %v2814_v45 = vshrl.u32 %v4642_v62, %v2811_v9  ;;  %v2817_v53 = vshrl.u32 %v4643_v0, %v2811_v9  ;;  %v2820_v43 = vshrl.u32 %v4644_v2, %v2811_v9  ;;  %v2812_v59 = vshrl.u32 %v4641_v58, %v2811_v9 }
 0x459   : > { %v2823_v13 = vshrl.u32 %v4645_v4, %v2811_v9  ;;  %v2826_v7 = vshrl.u32 %v4646_v14, %v2811_v9  ;;  %v2708_v44 = vsub.s32 32, %v2707_v15  ;;  %vm2830_vm1 = vcmp.lt.s32.totalorder %v2809_v57, 3 }
 0x45a   : > { %v2815_v60 = vor.u32 %v2814_v45, %v2813_v12  ;;  %v2818_v8 = vor.u32 %v2817_v53, %v2816_v27  ;;  %v2821_v21 = vor.u32 %v2820_v43, %v2819_v49  ;;  %vm2831_vm2 = vcmp.lt.s32.totalorder %v2809_v57, 4 }
 0x45b   : > { %v2824_v11 = vor.u32 %v2823_v13, %v2822_v31  ;;  %v2827_v50 = vor.u32 %v2826_v7, %v2825_v52  ;;  %v2710_v37 = vshll.u32 %v4641_v58, %v2707_v15  ;;  %v2711_v41 = vshrl.u32 %v4642_v62, %v2708_v44 }
 0x45c   : > { %v2832_v6 = vsel %vm2828_vm15, %v2812_v59, %v2815_v60  ;;  %v2833_v48 = vsel %vm2831_vm2, %v2821_v21, 2102212464  ;;  %v2836_v17 = vsel %vm2828_vm15, %v2815_v60, %v2818_v8  ;;  %v2840_v25 = vsel %vm2828_vm15, %v2818_v8, %v2821_v21 }
 0x45d   : > { %v2834_v36 = vsel %vm2830_vm1, %v2818_v8, %v2833_v48  ;;  %v2837_v55 = vsel %vm2831_vm2, %v2824_v11, 920167782  ;;  %v2841_v22 = vsel %vm2831_vm2, %v2827_v50, 1326507024  ;;  %v2713_v20 = vshll.u32 %v4642_v62, %v2707_v15 }
 0x45e   : > { %v2838_v33 = vsel %vm2830_vm1, %v2821_v21, %v2837_v55  ;;  %v2842_v23 = vsel %vm2830_vm1, %v2824_v11, %v2841_v22  ;;  %v2835_v38 = vsel %vm2829_vm0, %v2832_v6, %v2834_v36  ;;  %v2714_v61 = vshrl.u32 %v4643_v0, %v2708_v44 }
 0x45f   : > { %v2839_v26 = vsel %vm2829_vm0, %v2836_v17, %v2838_v33  ;;  %v2843_v39 = vsel %vm2829_vm0, %v2840_v25, %v2842_v23  ;;  %v2712_v28 = vor.u32 %v2711_v41, %v2710_v37  ;;  %v2716_v19 = vshll.u32 %v4643_v0, %v2707_v15 }
 0x460   : > { %v5397_v16 = vmul.u32.u64.low %v5366_v3, %v2843_v39  ;;  %v5398_v54 = vmul.u32.u64.high %v5366_v3, %v2843_v39, %v5397_v16  ;;  %v5401_v47 = vmul.u32.u64.low %v5366_v3, %v2839_v26  ;;  %v5402_v46 = vmul.u32.u64.high %v5366_v3, %v2839_v26, %v5401_v47 }
 0x461   : > { %v2715_v40 = vor.u32 %v2714_v61, %v2713_v20  ;;  %v2717_v56 = vshrl.u32 %v4644_v2, %v2708_v44  ;;  %v2709_v51 = vshrl.u32 %v4641_v58, %v2708_v44  ;;  %v2719_v57 = vshll.u32 %v4644_v2, %v2707_v15 }
 0x462   : > { %v2720_v63 = vshrl.u32 %v4645_v4, %v2708_v44  ;;  %v2723_v1 = vshrl.u32 %v4646_v14, %v2708_v44  ;;  %v2851_v9 = vmul.u32 %v5366_v3, %v2835_v38  ;;  %v2722_v27 = vshll.u32 %v4645_v4, %v2707_v15 }
 0x463   : > { %v2718_v12 = vor.u32 %v2717_v56, %v2716_v19  ;;  %vm2725_vm3 = vcmp.lt.s32.totalorder %v5368_v5, 1  ;;  %vm2853_vm4 = vc.u32 %v5398_v54, %v5401_v47  ;;  %v2854_v49 = vadd.s32 1, %v5402_v46 }
 0x464   : > { %v2721_v31 = vor.u32 %v2720_v63, %v2719_v57  ;;  %vm2726_vm6 = vcmp.lt.s32.totalorder %v5368_v5, 2  ;;  %v2724_v52 = vor.u32 %v2723_v1, %v2722_v27  ;;  %vm2727_vm7 = vcmp.lt.s32.totalorder %v5368_v5, 3 }
 0x465   : > { %vm2728_vm8 = vcmp.lt.s32.totalorder %v5368_v5, 4  ;;  %v2733_v45 = vsel %vm2725_vm3, %v2712_v28, %v2715_v40  ;;  %v2855_v3 = vsel %vm2853_vm4, %v2854_v49, %v5402_v46  ;;  %v2737_v15 = vsel %vm2725_vm3, %v2715_v40, %v2718_v12 }
 0x466   : > { %v2730_v53 = vsel %vm2728_vm8, %v2718_v12, 2102212464  ;;  %v2734_v43 = vsel %vm2728_vm8, %v2721_v31, 920167782  ;;  %v2856_v59 = vadd.s32 %v2855_v3, %v2851_v9  ;;  %v2729_v13 = vsel %vm2725_vm3, %v2709_v51, %v2712_v28 }
 0x467   : > { %v2735_v7 = vsel %vm2727_vm7, %v2718_v12, %v2734_v43  ;;  %v2738_v60 = vsel %vm2728_vm8, %v2724_v52, 1326507024  ;;  %v2731_v8 = vsel %vm2727_vm7, %v2715_v40, %v2730_v53  ;;  %vm3013_vm9 = vcmp.gt.s32.totalorder %v5374_v24, 0 }
 0x468   : > { %v2736_v21 = vsel %vm2726_vm6, %v2733_v45, %v2735_v7  ;;  %v2739_v44 = vsel %vm2727_vm7, %v2721_v31, %v2738_v60  ;;  %v2857_v11 = vadd.s32 536870912, %v2856_v59  ;;  %v3009_v36 = vand.u32 8388607, %v3002_v32 }
 0x469   : > { %v2740_v50 = vsel %vm2726_vm6, %v2737_v15, %v2739_v44  ;;  %v5425_v6 = vmul.u32.u64.low %v5370_v10, %v2736_v21  ;;  %v5426_v48 = vmul.u32.u64.high %v5370_v10, %v2736_v21, %v5425_v6  ;;  %v3014_v55 = vsel %vm3013_vm9, %v5374_v24, 0 }
 0x46a   : > { %v5430_v17 = vmul.u32.u64.low %v5370_v10, %v2740_v50  ;;  %v5431_v25 = vmul.u32.u64.high %v5370_v10, %v2740_v50, %v5430_v17  ;;  %v5436_v22 = vshrl.u32 %v2857_v11, 30  ;;  %v2732_v37 = vsel %vm2726_vm6, %v2729_v13, %v2731_v8 }
 0x46b   : > { %v3016_v33 = vand.u32 31, %v3014_v55  ;;  %v2751_v41 = vadd.s32 1, %v5426_v48  ;;  %v2902_v38 = vand.u32 2139095040, %v5364_v42  ;;  %v2748_v26 = vmul.u32 %v5370_v10, %v2732_v37 }
 0x46c   : > { %v2859_v23 = vshll.u32 %v5436_v22, 30  ;;  %vm2750_vm10 = vc.u32 %v5431_v25, %v5425_v6  ;;  %v3010_v39 = vor.u32 8388608, %v3009_v36  ;;  %v2899_v28 = vand.u32 2147483647, %v5364_v42 }
 0x46d   : > { %v3017_v20 = vsub.s32 32, %v3016_v33  ;;  %v2752_v61 = vsel %vm2750_vm10, %v2751_v41, %v5426_v48  ;;  %v2903_v40 = vshrl.u32 %v2902_v38, 23  ;;  %v2852_v19 = vadd.s32 %v5401_v47, %v5398_v54 }
 0x46e   : > { %v2860_v24 = vsub.s32 %v2856_v59, %v2859_v23  ;;  %v2753_v16 = vadd.s32 %v2752_v61, %v2748_v26  ;;  %v5451_v10 = vshll.u32 %v3010_v39, 8  ;;  %v5453_v63 = vshrl.u32 %v3014_v55, 5 }
 0x46f   : > { %v3020_v46 = vshrl.u32 %v4642_v62, %v3017_v20  ;;  %v3023_v51 = vshrl.u32 %v4643_v0, %v3017_v20  ;;  %v3019_v1 = vshll.u32 %v4641_v58, %v3016_v33  ;;  %v3026_v9 = vshrl.u32 %v4644_v2, %v3017_v20 }
 0x470   : > { %v2862_v5 = vsub.s32 0, %v2860_v24  ;;  %v2754_v56 = vadd.s32 536870912, %v2753_v16  ;;  %v3022_v27 = vshll.u32 %v4642_v62, %v3016_v33  ;;  %v3028_v49 = vshll.u32 %v4644_v2, %v3016_v33 }
 0x471   : > { %v3029_v54 = vshrl.u32 %v4645_v4, %v3017_v20  ;;  %v3021_v31 = vor.u32 %v3020_v46, %v3019_v1  ;;  %v3025_v52 = vshll.u32 %v4643_v0, %v3016_v33  ;;  %v3768_v45 = vadd.s32 4294967169, %v2903_v40 }
 0x472   : > { %v3765_v57 = vmin.u32 %v2862_v5, %v2860_v24  ;;  %v5457_v12 = vshrl.u32 %v2754_v56, 30  ;;  %v3024_v53 = vor.u32 %v3023_v51, %v3022_v27  ;;  %v3032_v15 = vshrl.u32 %v4646_v14, %v3017_v20 }
 0x473   : > { %v3030_v43 = vor.u32 %v3029_v54, %v3028_v49  ;;  %v2882_v13 = vsub.s32 4, %v5436_v22  ;;  %v3027_v7 = vor.u32 %v3026_v9, %v3025_v52  ;;  %v5468_v60 = vand.u32 8388607, %v2899_v28 }
 0x474   : > { %v2864_v47 = vclz %v3765_v57  ;;  %v2756_v3 = vshll.u32 %v5457_v12, 30  ;;  %v3018_v21 = vshrl.u32 %v4641_v58, %v3017_v20  ;;  %v3031_v44 = vshll.u32 %v4645_v4, %v3016_v33 }
 0x475   : > { %vm3037_vm12 = vcmp.lt.s32.totalorder %v5453_v63, 4  ;;  %vm3034_vm14 = vcmp.lt.s32.totalorder %v5453_v63, 1  ;;  %vm3036_vm15 = vcmp.lt.s32.totalorder %v5453_v63, 3  ;;  %vm5485_vm0 = vcmp.le.f32.partialorder %v2796_v35, 0.7853982 }
 0x476   : > { %v3766_v59 = vadd.s32 4294967294, %v2864_v47  ;;  %v5471_v8 = vsub.s32 %v2753_v16, %v2756_v3  ;;  %v3043_v11 = vsel %vm3037_vm12, %v3030_v43, 920167782  ;;  %v3033_v17 = vor.u32 %v3032_v15, %v3031_v44 }
 0x477   : > { %v3042_v36 = vsel %vm3034_vm14, %v3021_v31, %v3024_v53  ;;  %vm3035_vm1 = vcmp.lt.s32.totalorder %v5453_v63, 2  ;;  %v3044_v23 = vsel %vm3036_vm15, %v3027_v7, %v3043_v11  ;;  %v3038_v38 = vsel %vm3034_vm14, %v3018_v21, %v3021_v31 }
 0x478   : > { %vm3767_vm13 = vcmp.lt.s32.totalorder %v3766_v59, 0  ;;  %v2759_v48 = vsub.s32 0, %v5471_v8  ;;  %v3039_v26 = vsel %vm3037_vm12, %v3027_v7, 2102212464  ;;  %v3045_v61 = vsel %vm3035_vm1, %v3042_v36, %v3044_v23 }
 0x479   : > { %v2867_v50 = vsel %vm3767_vm13, 0, %v3766_v59  ;;  %v3046_v16 = vsel %vm3034_vm14, %v3024_v53, %v3027_v7  ;;  %v3047_v46 = vsel %vm3037_vm12, %v3033_v17, 1326507024  ;;  %v3040_v57 = vsel %vm3036_vm15, %v3024_v53, %v3039_v26 }
 0x47a   : > { %v2868_v37 = vsub.s32 32, %v2867_v50  ;;  %v2872_v33 = vsub.s32 4294967266, %v2867_v50  ;;  %v2869_v41 = vshll.u32 %v2860_v24, %v2867_v50  ;;  %v3761_v20 = vmin.u32 %v2759_v48, %v5471_v8  ;;  %v3105_v24 = vld [vmem:[%s5783_s6] sm:$0xff] }
 0x47b   : > { %v5507_v40 = vmul.u32.u64.low %v5451_v10, %v3045_v61  ;;  %v5508_v56 = vmul.u32.u64.high %v5451_v10, %v3045_v61, %v5507_v40  ;;  %v3048_v1 = vsel %vm3036_vm15, %v3030_v43, %v3047_v46  ;;  %v2909_v49 = vadd.s32 1, %v3768_v45 }
 0x47c   : > { %v2870_v35 = vshrl.u32 %v2852_v19, %v2868_v37  ;;  %v2873_v39 = vadd.s32 127, %v2872_v33  ;;  %v2761_v5 = vclz %v3761_v20  ;;  %v3049_v27 = vsel %vm3035_vm1, %v3046_v16, %v3048_v1 }
 0x47d   : > { %v5518_v54 = vsel %vm998_vm5, %v3105_v24, 0  ;;  %v2883_v31 = vsel %vm2798_vm11, %v2882_v13, %v5436_v22  ;;  %v5524_v52 = vmul.u32.u64.low %v5451_v10, %v3049_v27  ;;  %v5525_v3 = vmul.u32.u64.high %v5451_v10, %v3049_v27, %v5524_v52 }
 0x47e   : > { %v2871_v19 = vor.u32 %v2870_v35, %v2869_v41  ;;  %v2874_v51 = vshll.u32 %v2873_v39, 23  ;;  %v3762_v9 = vadd.s32 4294967294, %v2761_v5  ;;  %v3041_v53 = vsel %vm3035_vm1, %v3038_v38, %v3040_v57 }
 0x47f   : > { %v3060_v43 = vadd.s32 1, %v5508_v56  ;;  %vm2910_vm3 = vcmp.gt.s32.totalorder %v2909_v49, 0  ;;  %v2885_v21 = vsel %vm5485_vm0, 0, %v2883_v31  ;;  %v2749_v22 = vadd.s32 %v5425_v6, %v5431_v25 }
 0x480   : > { %v2875_v47 = vor.u32 4788187, %v2874_v51  ;;  %vm3763_vm2 = vcmp.lt.s32.totalorder %v3762_v9, 0  ;;  %v2878_v15 = vcvt.s32.f32 %v2871_v19  ;;  %v2911_v7 = vsel %vm2910_vm3, %v2909_v49, 0 }
 0x481   : > { %v2764_v59 = vsel %vm3763_vm2, 0, %v3762_v9  ;;  %v3057_v50 = vmul.u32 %v5451_v10, %v3041_v53  ;;  %vm3059_vm4 = vc.u32 %v5525_v3, %v5507_v40  ;;  %v2913_v63 = vand.u32 31, %v2911_v7 }
 0x482   : > { %v2876_v45 = vand.u32 2147483647, %v2875_v47  ;;  %v2765_v13 = vsub.s32 32, %v2764_v59  ;;  %v2769_v44 = vsub.s32 4294967266, %v2764_v59  ;;  %vm2695_vm6 = vcmp.lt.s32.totalorder %v5351_v30, 0 }
 0x483   : > { %v2766_v48 = vshll.u32 %v5471_v8, %v2764_v59  ;;  %v3061_v37 = vsel %vm3059_vm4, %v3060_v43, %v5508_v56  ;;  %v5540_v23 = vand.u32 3, %v2885_v21  ;;  %v2914_v25 = vsub.s32 32, %v2913_v63 }
 0x484   : > { %v2879_v11 = vmul.f32 %v2878_v15, %v2876_v45  ;;  %v2767_v17 = vshrl.u32 %v2749_v22, %v2765_v13  ;;  %v2770_v36 = vadd.s32 127, %v2769_v44  ;;  %v3062_v6 = vadd.s32 %v3061_v37, %v3057_v50 }
 0x485   : > { %v2779_v10 = vsub.s32 4, %v5457_v12  ;;  %v2907_v38 = vor.u32 8388608, %v5468_v60  ;;  %v5546_v8 = vshrl.u32 %v2911_v7, 5  ;;  %v2916_v39 = vshll.u32 %v4641_v58, %v2913_v63 }
 0x486   : > { %v2880_v33 = vxor.u32 2147483648, %v2879_v11  ;;  %v2768_v41 = vor.u32 %v2767_v17, %v2766_v48  ;;  %v2771_v20 = vshll.u32 %v2770_v36, 23  ;;  %v3063_v35 = vadd.s32 536870912, %v3062_v6 }
 0x487   : > { %vm5554_vm7 = vcmp.le.f32.partialorder %v2693_v18, 0.7853982  ;;  %v2917_v60 = vshrl.u32 %v4642_v62, %v2914_v25  ;;  %v2920_v5 = vshrl.u32 %v4643_v0, %v2914_v25  ;;  %v2922_v56 = vshll.u32 %v4643_v0, %v2913_v63 }
 0x488   : > { %v2881_v26 = vsel %vm2798_vm11, %v2880_v33, %v2879_v11  ;;  %v2772_v24 = vor.u32 4788187, %v2771_v20  ;;  %v5560_v46 = vshrl.u32 %v3063_v35, 30  ;;  %v2923_v19 = vshrl.u32 %v4644_v2, %v2914_v25 }
 0x489   : > { %v2884_v61 = vsel %vm5485_vm0, %v5349_v29, %v2881_v26  ;;  %v2775_v51 = vcvt.s32.f32 %v2768_v41  ;;  %v2919_v18 = vshll.u32 %v4642_v62, %v2913_v63  ;;  %v2925_v9 = vshll.u32 %v4644_v2, %v2913_v63 }
 0x48a   : > { %4558 = vcosq.f32 %v2884_v61  ;;  %v2773_v55 = vand.u32 2147483647, %v2772_v24  ;;  %v3065_v57 = vshll.u32 %v5560_v46, 30  ;;  %v2924_v1 = vor.u32 %v2923_v19, %v2922_v56 }
 0x48b   : > { %4560 = vsinq.f32 %v2884_v61  ;;  %v2926_v27 = vshrl.u32 %v4645_v4, %v2914_v25  ;;  %v2918_v47 = vor.u32 %v2917_v60, %v2916_v39  ;;  %v2921_v31 = vor.u32 %v2920_v5, %v2919_v18 }
 0x48c   : > { %v2776_v49 = vmul.f32 %v2775_v51, %v2773_v55  ;;  %v2929_v52 = vshrl.u32 %v4646_v14, %v2914_v25  ;;  %vm2894_vm8 = vcmp.eq.s32.totalorder %v5540_v23, 2  ;;  %v2780_v0 = vsel %vm2695_vm6, %v2779_v10, %v5457_v12 }
 0x48d   : > { %v5573_v53 = vsub.s32 %v3062_v6, %v3065_v57  ;;  %v2927_v62 = vor.u32 %v2926_v27, %v2925_v9  ;;  %v5575_v43 = vshll.u32 %v2907_v38, 8  ;;  %vm2891_vm9 = vcmp.eq.s32.totalorder %v5540_v23, 0 }
 0x48e   : > { %v2777_v2 = vxor.u32 2147483648, %v2776_v49  ;;  %v2928_v45 = vshll.u32 %v4645_v4, %v2913_v63  ;;  %vm2934_vm10 = vcmp.lt.s32.totalorder %v5546_v8, 4  ;;  %v5581_v14 = vand.u32 4294901760, %v5518_v54 }
 0x48f   : > { %vm2890_vm11 = vcmp.lt.s32.totalorder %v5540_v23, 2  ;;  %v3068_v15 = vsub.s32 0, %v5573_v53  ;;  %v2915_v12 = vshrl.u32 %v4641_v58, %v2914_v25  ;;  %vm2931_vm12 = vcmp.lt.s32.totalorder %v5546_v8, 1 }
 0x490   : > { %v2936_v59 = vsel %vm2934_vm10, %v2924_v1, 2102212464  ;;  %vm2888_vm13 = vweird.f32 %v5349_v29  ;;  %v2778_v4 = vsel %vm2695_vm6, %v2777_v2, %v2776_v49  ;;  %v2930_v7 = vor.u32 %v2929_v52, %v2928_v45 }
 0x491   : > { %v2939_v21 = vsel %vm2931_vm12, %v2918_v47, %v2921_v31  ;;  %v2940_v22 = vsel %vm2934_vm10, %v2927_v62, 920167782  ;;  %v2781_v58 = vsel %vm5554_vm7, %v5351_v30, %v2778_v4  ;;  %v3773_v13 = vmin.u32 %v3068_v15, %v5573_v53 }
 0x492   : > { %vm2932_vm14 = vcmp.lt.s32.totalorder %v5546_v8, 2  ;;  %vm2933_vm15 = vcmp.lt.s32.totalorder %v5546_v8, 3  ;;  %4562 = vcosq.f32 %v2781_v58  ;;  %v2935_v44 = vsel %vm2931_vm12, %v2915_v12, %v2918_v47 }
 0x493   : > { %v2937_v11 = vsel %vm2933_vm15, %v2921_v31, %v2936_v59  ;;  %v2941_v50 = vsel %vm2933_vm15, %v2924_v1, %v2940_v22  ;;  %4564 = vsinq.f32 %v2781_v58  ;;  %v3070_v48 = vclz %v3773_v13 }
 0x494   : > { %v4559_v63 = vpop.eup %4558  ;;  %v2942_v17 = vsel %vm2932_vm14, %v2939_v21, %v2941_v50  ;;  %v2943_v36 = vsel %vm2931_vm12, %v2921_v31, %v2924_v1  ;;  %v2944_v6 = vsel %vm2934_vm10, %v2930_v7, 1326507024  ;;  %v2782_v10 = vsel %vm5554_vm7, 0, %v2780_v0 }
 0x495   : > { %v4561_v37 = vpop.eup %4560  ;;  %v2895_v33 = vxor.u32 2147483648, %v4559_v63  ;;  %v5615_v25 = vmul.u32.u64.low %v5575_v43, %v2942_v17  ;;  %v5616_v41 = vmul.u32.u64.high %v5575_v43, %v2942_v17, %v5615_v25  ;;  %v3774_v38 = vadd.s32 4294967294, %v3070_v48 }
 0x496   : > { %v2892_v20 = vxor.u32 2147483648, %v4561_v37  ;;  %v2945_v26 = vsel %vm2933_vm15, %v2927_v62, %v2944_v6  ;;  %v2938_v39 = vsel %vm2932_vm14, %v2935_v44, %v2937_v11  ;;  %v5631_v24 = vsub.f32 %v5518_v54, %v5581_v14 }
 0x497   : > { %v2896_v35 = vsel %vm2894_vm8, %v2895_v33, %v4561_v37  ;;  %v2946_v61 = vsel %vm2932_vm14, %v2943_v36, %v2945_v26  ;;  %vm3775_vm0 = vcmp.lt.s32.totalorder %v3774_v38, 0  ;;  %v2957_v55 = vadd.s32 1, %v5616_v41 }
 0x498   : > { %v2893_v16 = vsel %vm2891_vm9, %v4559_v63, %v2892_v20  ;;  %v5636_v60 = vmul.u32.u64.low %v5575_v43, %v2946_v61  ;;  %v5637_v5 = vmul.u32.u64.high %v5575_v43, %v2946_v61, %v5636_v60  ;;  %v3073_v19 = vsel %vm3775_vm0, 0, %v3774_v38 }
 0x499   : > { %v2897_v56 = vsel %vm2890_vm11, %v2893_v16, %v2896_v35  ;;  %v3196_v8 = vand.u32 4294901760, %v5631_v24  ;;  %v3058_v51 = vadd.s32 %v5507_v40, %v5525_v3  ;;  %v3074_v18 = vsub.s32 32, %v3073_v19 }
 0x49a   : > { %v5645_v54 = vsel %vm2888_vm13, nan, %v2897_v56  ;;  %v3078_v57 = vsub.s32 4294967266, %v3073_v19  ;;  %v2786_v1 = vand.u32 3, %v2782_v10  ;;  %v2954_v9 = vmul.u32 %v5575_v43, %v2938_v39 }
 0x49b   : > { %v3197_v23 = vsub.f32 %v5631_v24, %v3196_v8  ;;  %v3075_v27 = vshll.u32 %v5573_v53, %v3073_v19  ;;  %v3076_v49 = vshrl.u32 %v3058_v51, %v3074_v18  ;;  %vm2956_vm1 = vc.u32 %v5637_v5, %v5615_v25 }
 0x49c   : > { %v3079_v47 = vadd.s32 127, %v3078_v57  ;;  %v4563_v29 = vpop.eup %4562  ;;  %v2958_v31 = vsel %vm2956_vm1, %v2957_v55, %v5616_v41  ;;  %vm2791_vm2 = vcmp.eq.s32.totalorder %v2786_v1, 2  ;;  %vm2788_vm3 = vcmp.eq.s32.totalorder %v2786_v1, 0 }
 0x49d   : > { %v3198_v40 = vand.u32 4294901760, %v3197_v23  ;;  %v4565_v3 = vpop.eup %4564  ;;  %v2792_v52 = vxor.u32 2147483648, %v4563_v29  ;;  %v3077_v0 = vor.u32 %v3076_v49, %v3075_v27  ;;  %v2959_v43 = vadd.s32 %v2958_v31, %v2954_v9 }
 0x49e   : > { %v3080_v62 = vshll.u32 %v3079_v47, 23  ;;  %v2789_v2 = vxor.u32 2147483648, %v4565_v3  ;;  %v3129_v12 = vand.u32 4294901760, %v5645_v54  ;;  %vm2785_vm4 = vweird.f32 %v5351_v30 }
 0x49f   : > { %4166 = vmatprep.mubr.f32.mxu1 %v3198_v40  ;;  %v2793_v45 = vsel %vm2791_vm2, %v2792_v52, %v4565_v3  ;;  %v2960_v15 = vadd.s32 536870912, %v2959_v43  ;;  %vm2787_vm6 = vcmp.lt.s32.totalorder %v2786_v1, 2  ;;  %v3084_v21 = vcvt.s32.f32 %v3077_v0  ;;  %v3106_v3 = vld [vmem:[%s5783_s6 + $0x8] sm:$0xff] }
 0x4a0   : > { %v3081_v53 = vor.u32 4788187, %v3080_v62  ;;  %v2790_v59 = vsel %vm2788_vm3, %v4563_v29, %v2789_v2  ;;  %vm3004_vm7 = vcmp.lt.s32.totalorder %v5357_v34, 0  ;;  %vm5670_vm8 = vcmp.le.f32.partialorder %v3002_v32, 0.7853982 }
 0x4a1   : > { %v2794_v4 = vsel %vm2787_vm6, %v2790_v59, %v2793_v45  ;;  %v2961_v22 = vshrl.u32 %v2960_v15, 30  ;;  %v3088_v20 = vsub.s32 4, %v5560_v46  ;;  %v2955_v38 = vadd.s32 %v5615_v25, %v5637_v5 }
 0x4a2   : > { %v3082_v7 = vand.u32 2147483647, %v3081_v53  ;;  %v2795_v58 = vsel %vm2785_vm4, nan, %v2794_v4  ;;  %vm5687_vm12 = vcmp.le.f32.partialorder %v2899_v28, 0.7853982  ;;  %vm2901_vm13 = vcmp.lt.s32.totalorder %v5364_v42, 0 }
 0x4a3   : > { %v3126_v13 = vand.u32 4294901760, %v2795_v58  ;;  %v2962_v11 = vshll.u32 %v2961_v22, 30  ;;  %v3089_v16 = vsel %vm3004_vm7, %v3088_v20, %v5560_v46  ;;  %v2985_v31 = vsub.s32 4, %v2961_v22 }
 0x4a4   : > { %v3085_v44 = vmul.f32 %v3084_v21, %v3082_v7  ;;  %v3091_v55 = vsel %vm5670_vm8, 0, %v3089_v16  ;;  %v3123_v0 = vsel %vm998_vm5, %v3106_v3, 0  ;;  %vm3094_vm15 = vweird.f32 %v5357_v34 }
 0x4a5   : > { %v5661_v50 = vpack.c.bf16 %v3129_v12, %v3126_v13  ;;  %v2963_v48 = vsub.s32 %v2959_v43, %v2962_v11  ;;  %v3095_v25 = vand.u32 3, %v3091_v55  ;;  %v2986_v52 = vsel %vm2901_vm13, %v2985_v31, %v2961_v22 }
 0x4a6   : > { %v3086_v63 = vxor.u32 2147483648, %v3085_v44  ;;  %v5700_v62 = vsub.f32 %v2795_v58, %v3126_v13  ;;  %v3223_v43 = vsub.f32 %v5645_v54, %v3129_v12  ;;  %v2988_v45 = vsel %vm5687_vm12, 0, %v2986_v52 }
 0x4a7   : > { %v2965_v17 = vsub.s32 0, %v2963_v48  ;;  %4321 = vmatprep.subr.bf16.mxu1 %v5661_v50  ;;  %vm3097_vm10 = vcmp.eq.s32.totalorder %v3095_v25, 0  ;;  %vm3100_vm11 = vcmp.eq.s32.totalorder %v3095_v25, 2  ;;  %vm3096_vm14 = vcmp.lt.s32.totalorder %v3095_v25, 2 }
 0x4a8   : > { %v3087_v30 = vsel %vm3004_vm7, %v3086_v63, %v3085_v44  ;;  %4323 = vmatpush3.bf16.msra.mxu1 %v5661_v50  ;;  %v5707_v53 = vand.u32 4294901760, %v3123_v0  ;;  %v3217_v59 = vand.u32 4294901760, %v5700_v62  ;;  %v3224_v4 = vand.u32 4294901760, %v3223_v43 }
 0x4a9   : > { %v3769_v37 = vmin.u32 %v2965_v17, %v2963_v48  ;;  %v3090_v33 = vsel %vm5670_vm8, %v5357_v34, %v3087_v30  ;;  %v2992_v7 = vand.u32 3, %v2988_v45  ;;  %vm2991_vm1 = vweird.f32 %v5364_v42 }
 0x4aa   : > { %4566 = vcosq.f32 %v3090_v33  ;;  %v3205_v21 = vsub.f32 %v3123_v0, %v5707_v53  ;;  %v3218_v13 = vsub.f32 %v5700_v62, %v3217_v59  ;;  %v3225_v44 = vsub.f32 %v3223_v43, %v3224_v4 }
 0x4ab   : > { %v2967_v6 = vclz %v3769_v37  ;;  %4568 = vsinq.f32 %v3090_v33  ;;  %vm2997_vm5 = vcmp.eq.s32.totalorder %v2992_v7, 2  ;;  %vm2994_vm0 = vcmp.eq.s32.totalorder %v2992_v7, 0 }
 0x4ac   : > { %v3206_v63 = vand.u32 4294901760, %v3205_v21  ;;  %vm2993_vm2 = vcmp.lt.s32.totalorder %v2992_v7, 2  ;;  %v3219_v17 = vand.u32 4294901760, %v3218_v13  ;;  %v3226_v36 = vand.u32 4294901760, %v3225_v44 }
 0x4ad   : > { %v3770_v41 = vadd.s32 4294967294, %v2967_v6 }
 0x4af   : > { %vm3771_vm9 = vcmp.lt.s32.totalorder %v3770_v41, 0 }
 0x4b0   : > { %v2970_v10 = vsel %vm3771_vm9, 0, %v3770_v41  ;;  %v3207_v41 = vsub.f32 %v3205_v21, %v3206_v63 }
 0x4b1   : > { %v2971_v32 = vsub.s32 32, %v2970_v10  ;;  %v2975_v26 = vsub.s32 4294967266, %v2970_v10  ;;  %v2972_v35 = vshll.u32 %v2963_v48, %v2970_v10  ;;  %v4328_v10 = vpack.c.bf16 %v3226_v36, %v3219_v17 }
 0x4b3   : > { %v2973_v39 = vshrl.u32 %v2955_v38, %v2971_v32  ;;  %v2976_v61 = vadd.s32 127, %v2975_v26  ;;  %v3208_v26 = vand.u32 4294901760, %v3207_v41 }
 0x4b4   : > { %v4567_v19 = vpop.eup %4566 }
 0x4b5   : > { %v2974_v60 = vor.u32 %v2973_v39, %v2972_v35  ;;  %v2977_v56 = vshll.u32 %v2976_v61, 23  ;;  %v4569_v18 = vpop.eup %4568  ;;  %v3101_v9 = vxor.u32 2147483648, %v4567_v19 }
 0x4b6   : > { %v3098_v5 = vxor.u32 2147483648, %v4569_v18 }
 0x4b7   : > { %v2978_v51 = vor.u32 4788187, %v2977_v56  ;;  %v2981_v1 = vcvt.s32.f32 %v2974_v60  ;;  %v3102_v47 = vsel %vm3100_vm11, %v3101_v9, %v4569_v18  ;;  %v4336_v60 = vpack.c.bf16 %v3223_v43, %v5700_v62 }
 0x4b8   : > { %v3099_v49 = vsel %vm3097_vm10, %v4567_v19, %v3098_v5  ;;  %v4352_v19 = vpack.c.bf16 %v3224_v4, %v3217_v59 }
 0x4b9   : > { %v2979_v57 = vand.u32 2147483647, %v2978_v51  ;;  %v3103_v28 = vsel %vm3096_vm14, %v3099_v49, %v3102_v47  ;;  %v3112_v51 = vpop.permute.xlu1 %3111 }
 0x4ba   : > { %v3104_v2 = vsel %vm3094_vm15, nan, %v3103_v28 }
 0x4bb   : > { %v2982_v23 = vmul.f32 %v2981_v1, %v2979_v57  ;;  %v3135_v15 = vand.u32 4294901760, %v3104_v2 }
 0x4bd   : > { %v2983_v27 = vxor.u32 2147483648, %v2982_v23  ;;  %v3237_v54 = vsub.f32 %v3104_v2, %v3135_v15 }
 0x4bf   : > { %v2984_v29 = vsel %vm2901_vm13, %v2983_v27, %v2982_v23  ;;  %v3238_v37 = vand.u32 4294901760, %v3237_v54 }
 0x4c0   : > { %v2987_v40 = vsel %vm5687_vm12, %v5364_v42, %v2984_v29 }
 0x4c1   : > { %4570 = vcosq.f32 %v2987_v40  ;;  %v3239_v32 = vsub.f32 %v3237_v54, %v3238_v37 }
 0x4c2   : > { %4572 = vsinq.f32 %v2987_v40 }
 0x4c3   : > { %v3240_v42 = vand.u32 4294901760, %v3239_v32 }
 0x4cb   : > { %v4571_v34 = vpop.eup %4570 }
 0x4cc   : > { %v4573_v22 = vpop.eup %4572  ;;  %v2998_v58 = vxor.u32 2147483648, %v4571_v34 }
 0x4cd   : > { %v2995_v12 = vxor.u32 2147483648, %v4573_v22 }
 0x4ce   : > { %v2999_v11 = vsel %vm2997_vm5, %v2998_v58, %v4573_v22 }
 0x4cf   : > { %v2996_v48 = vsel %vm2994_vm0, %v4571_v34, %v2995_v12 }
 0x4d0   : > { %v3000_v30 = vsel %vm2993_vm2, %v2996_v48, %v2999_v11 }
 0x4d1   : > { %v3001_v33 = vsel %vm2991_vm1, nan, %v3000_v30 }
 0x4d2   : > { %v3132_v6 = vand.u32 4294901760, %v3001_v33 }
 0x4d4   : > { %v4324_v20 = vpack.c.bf16 %v3135_v15, %v3132_v6  ;;  %v3230_v38 = vsub.f32 %v3001_v33, %v3132_v6 }
 0x4d6   : > { %4325 = vmatprep.subr.bf16.mxu1 %v4324_v20  ;;  %v3231_v35 = vand.u32 4294901760, %v3230_v38  ;;  %v4340_v56 = vpack.c.bf16 %v3237_v54, %v3230_v38 }
 0x4d7   : > { %4327 = vmatpush3.bf16.msra.mxu1 %v4324_v20 }
 0x4d8   : > { %4329 = vmatprep.subr.bf16.mxu1 %v4328_v10  ;;  %v3232_v39 = vsub.f32 %v3230_v38, %v3231_v35  ;;  %v4356_v55 = vpack.c.bf16 %v3238_v37, %v3231_v35 }
 0x4da   : > { %4167 = vmatmul.mubr.f32.vlgmr.msra.gmra.mrb[4].mxu1 %v3208_v26  ;;  %v3233_v61 = vand.u32 4294901760, %v3232_v39 }
 0x4db   : > { %4331 = vmatpush3.bf16.msra.mxu1 %v4328_v10  ;;  %4177 = vmatprep.mubr.f32.mxu1 %v5581_v14 }
 0x4dc   : > { %v4332_v16 = vpack.c.bf16 %v3240_v42, %v3233_v61 }
 0x4de   : > { %4333 = vmatprep.subr.bf16.mxu1 %v4332_v16 }
 0x4df   : > { %4335 = vmatpush3.bf16.msra.mxu1 %v4332_v16 }
 0x4e0   : > { %4337 = vmatprep.subr.bf16.mxu1 %v4336_v60 }
 0x4e2   : > { %4178 = vmatmul.mubr.f32.vlgmr.msra.gmra.mrb[4].mxu1 %v5707_v53 }
 0x4e3   : > { %4339 = vmatpush3.bf16.msra.mxu1 %v4336_v60  ;;  %4188 = vmatprep.mubr.f32.mxu1 %v5631_v24  ;;  %v3117_v24 = vpop.permute.xlu0 %3116 }
 0x4e4   : > { %4341 = vmatprep.subr.bf16.mxu1 %v4340_v56 }
 0x4e7   : > { %4343 = vmatpush3.bf16.msra.mxu1 %v4340_v56 }
 0x4e8   : > { %4345 = vmatprep.subr.bf16.mxu1 %v5661_v50 }
 0x4ea   : > { %4189 = vmatmul.mubr.f32.vlgmr.msra.gmra.mrb[4].mxu1 %v3205_v21 }
 0x4eb   : > { %4347 = vmatpush3.bf16.msra.mxu1 %v5661_v50  ;;  %4199 = vmatprep.mubr.f32.mxu1 %v3196_v8 }
 0x4ec   : > { %4349 = vmatprep.subr.bf16.mxu1 %v4324_v20 }
 0x4ef   : > { %4351 = vmatpush3.bf16.msra.mxu1 %v4324_v20 }
 0x4f0   : > { %4353 = vmatprep.subr.bf16.mxu1 %v4352_v19 }
 0x4f2   : > { %4200 = vmatmul.mubr.f32.vlgmr.msra.gmra.mrb[4].mxu1 %v3206_v63 }
 0x4f3   : > { %4355 = vmatpush3.bf16.msra.mxu1 %v4352_v19  ;;  %4210 = vmatprep.mubr.f32.mxu1 %v5581_v14 }
 0x4f4   : > { %4357 = vmatprep.subr.bf16.mxu1 %v4356_v55 }
 0x4f7   : > { %4359 = vmatpush3.bf16.msra.mxu1 %v4356_v55 }
 0x4f8   : > { %4361 = vmatprep.subr.bf16.mxu1 %v5661_v50 }
 0x4fa   : > { %4211 = vmatmul.mubr.f32.vlgmr.msra.gmra.mrb[4].mxu1 %v5707_v53 }
 0x4fb   : > { %4363 = vmatpush3.bf16.msra.mxu1 %v5661_v50  ;;  %4221 = vmatprep.mubr.f32.mxu1 %v5581_v14 }
 0x4fc   : > { %4365 = vmatprep.subr.bf16.mxu1 %v4324_v20 }
 0x4ff   : > { %4367 = vmatpush3.bf16.msra.mxu1 %v4324_v20 }
 0x502   : > { %4222 = vmatmul.mubr.f32.vlgmr.msra.gmra.mrb[4].mxu1 %v5707_v53 }
 0x5d5   : > { %v4223_v8 = vpop.f32.mrb[4].mxu1 }
 0x5d6   : > { %v4380_v50 = vadd.f32 %v4223_v8, %v3117_v24  ;;  %v3643_v14 = vpop.f32.mrb[5].mxu1 }
 0x5d7   : > { %v4381_v18 = vadd.f32 %v3643_v14, %v3112_v51 }
 0x5d8   : > { %3654 = vst [vmem:[%s296_s17 + $0x8] sm:$0xff] %v4380_v50 }
 0x5d9   : > { %3653 = vst [vmem:[%s296_s17] sm:$0xff] %v4381_v18 }
 0x5da   : > { %4587 = shalt.err (!%p4584_p3)
}
 0x5db   : > { %s4588_s10 = scalar_lea.hbm %s5734_s22, 256  ;;  %s4592_s17 = scalar_lea.hbm %s5785_s8, 512 }
 0x5dc   : > { %p4589_p4 = scmp.ne.s32.totalorder %s5734_s22, %s4588_s10  ;;  %p4593_p9 = scmp.lt.u32.totalorder %s5734_s22, %s5785_s8 }
 0x5dd   : > { %p4594_p10 = scmp.lt.u32.totalorder %s4592_s17, %s4588_s10  ;;  %p4596_p12 = scmp.lt.u32.totalorder %s4588_s10, %s5734_s22 }
 0x5de   : > { %p4590_p7 = pnand %p4589_p4, %p4734_p5 }
 0x5df   : > { %p4595_p11 = por %p4594_p10, %p4593_p9 }
 0x5e0   : > { %p4591_p8 = pneg %p4590_p7 }
 0x5e1   : > { %p4597_p13 = por %p4596_p12, %p4595_p11 }
 0x5e3   : > { %p4598_p0 = pnand %p4597_p13, %p4591_p8 }
 0x5e5   : > { %4601 = shalt.err (!%p4598_p0)
}
 0x5e6   : > { %s4648_s21 = smov 128   ;;  %s4649_s9 = smov 256  }
 0x5e7   : > { %s4650_s24 = smov 8  }
 0x5e8   : > { %4484 = dma.vmem_to_hbm [thread:$0]  (%p4734_p5), %s5729_s18, 256, %s5734_s22, %s5736_s23, %s4648_s21, %s4649_s9, %s4650_s24  }
 0x5e9 PF: > { %p4490_p1 = scmp.ge.s32.totalorder %s4636_s30, 2  ;;  %s3683_s25 = sand.u32 1, %s4624_s27  }
 0x5ea   : > { %s3684_s26 = scalar_lea.sflag [#allocation3], %s3683_s25 }
 0x5eb   : > { %p4487_p2 = pnand %p4490_p1, %p4738_p6 }
 0x5ed   : > { %4619 = dma.done.wait (!%p4487_p2), %s3684_s26, 256  }
 0x5ee   : > { %4621 = vsyncadd (!%p4487_p2), %s3684_s26, 4294967040  ;;  %p18_p3 = scmp.ge.s32.totalorder %s4721_s11, 4   ;;  %s5804_s27 = smov %s4628_s28 }
 0x5ef   : > { %s5805_s28 = smov %s4632_s29  ;;  %s5806_s29 = smov %s4732_s14 }
 0x5f0   : > { %s5807_s30 = smov %s4721_s11  ;;  %20 = sbr.rel (!%p18_p3) target bundleno = 3 (0x3), region = 89 }
 0x5f7   :  { %3689 = vsyncpa [#allocation3], 1 }
 0x5f8   :  { %3691 = vsyncpa [#allocation3 + $0x1], 1 }

</bundles_post_ra>
